<compile_context>
chip_gen: v6e
topology: v6e:2x2x1
jax: 0.10.0
libtpu: 0.0.40
codegen_flags: <defaults>
</compile_context>

<pallas_src>
import functools

import jax
import jax.numpy as jnp
from jax.experimental import pallas as pl
from jax.experimental.pallas import tpu as pltpu

BN_EPS = 1e-5


def _nonlocal_kernel(xf_ref, w_sa_ref, b_sa_ref, w_gs_ref, b_gs_ref,
                     w_out_ref, b_out_ref, o_ref, ga_scr, spt_scr,
                     *, tq, n, inter):
    # xf_ref : (1, C, N) bf16 full-spatial block (same block for all q of b)
    # scratch: ga_scr (I, N) bf16, spt_scr (N, I) bf16 -- cached per image.
    q = pl.program_id(1)

    # ---- once per image: full-N guide/src projections cached in VMEM scratch
    @pl.when(q == 0)
    def _():
        gs = jnp.dot(w_gs_ref[...], xf_ref[0],
                     preferred_element_type=jnp.float32) + b_gs_ref[...]
        ga_scr[...] = gs[:inter].astype(jnp.bfloat16)            # (I, N)
        spt_scr[...] = gs[inter:].T.astype(jnp.bfloat16)         # (N, I), one-time transpose

    # ---- query tile of the resident bf16 x block (no second x operand)
    if tq == n:
        x_q = xf_ref[0]                                          # (C, N)
    else:
        start = pl.multiple_of(q * tq, tq)
        x_q = xf_ref[0, :, pl.ds(start, tq)]                     # (C, TQ)

    # src_attn projection for this query tile: (I, TQ) -> (TQ, I)
    sa = jnp.dot(w_sa_ref[...], x_q,
                 preferred_element_type=jnp.float32) + b_sa_ref[...]
    sa_t = sa.T.astype(jnp.bfloat16)                             # small transpose only

    # logits (TQ, N) = sa^T @ ga   (both operands in native MXU orientation)
    logits = jnp.dot(sa_t, ga_scr[...], preferred_element_type=jnp.float32)

    # row-wise softmax (exact per query tile: each row spans the full N)
    m = jnp.max(logits, axis=-1, keepdims=True)
    e = jnp.exp(logits - m)
    inv = pl.reciprocal(jnp.sum(e, axis=-1, keepdims=True), approx=True)
    attn = (e * inv).astype(jnp.bfloat16)                        # (TQ, N)

    # y (TQ, I) = attn @ sp^T   (the big attn tile is never transposed)
    y = jnp.dot(attn, spt_scr[...], preferred_element_type=jnp.float32)

    # output conv with eval-mode BN folded in: z (C, TQ) = w_out' @ y^T + b_out'
    z = jax.lax.dot_general(w_out_ref[...], y.astype(jnp.bfloat16),
                            (((1,), (1,)), ((), ())),
                            preferred_element_type=jnp.float32) + b_out_ref[...]

    # ReLU + residual (residual at bf16 precision of x; mirrored in reference)
    o_ref[0] = jnp.maximum(z, 0.0) + x_q.astype(jnp.float32)


def _vmem_budget_bytes():
    try:
        cap = pltpu.get_tpu_info().vmem_capacity_bytes
    except Exception:
        cap = 64 << 20              # conservative fallback (v7x-sized)
    return int(0.85 * cap)


def _estimate_vmem(c, n, inter, tq):
    return (2 * c * n * 2           # bf16 x block (double-buffered)
            + 2 * c * tq * 4        # f32 output tile (double-buffered)
            + 4 * inter * n         # bf16 ga + sp^T scratch
            + 3 * tq * n * 4        # logits / exp / attn temporaries
            + 8 * inter * n         # one-time f32 gs temporary (q == 0)
            + 2 * (4 * inter * c * 2 + (3 * inter + 2 * c) * 4))  # weights/biases


def _pick_tq(n, c, inter, budget):
    """Largest TQ in {512, 256, 128} dividing N whose VMEM estimate fits."""
    if n % 128 != 0:
        # TODO(synk): key-tiled (flash-style) softmax for large non-aligned N.
        return n
    cands = [t for t in (512, 256, 128) if n % t == 0]   # no 384 (MXU pass util)
    if not cands:
        return n
    for t in cands:
        if _estimate_vmem(c, n, inter, t) <= budget:
            return t
    return cands[-1]


def nonlocal_block(x_nchw, prepped):
    """x_nchw: (B, C, W, H) float32; prepped: output of prepare_params()."""
    w_sa, b_sa, w_gs, b_gs, w_out, b_out = prepped
    B, C, W, H = x_nchw.shape
    N = W * H
    I = w_sa.shape[0]

    budget = _vmem_budget_bytes()
    TQ = _pick_tq(N, C, I, budget)
    n_q = max(N // TQ, 1)

    est = _estimate_vmem(C, N, I, TQ)
    vmem_limit = int(min(max(est + (16 << 20), 32 << 20), budget))

    # Channel-major layout, spatial flattened onto the lane dim; bf16 feed.
    x = x_nchw.reshape(B, C, N).astype(jnp.bfloat16)

    kernel = functools.partial(_nonlocal_kernel, tq=TQ, n=N, inter=I)

    def rep(shape):
        # replicated (weight / bias) operand: same block every grid step
        return pl.BlockSpec(shape, lambda b, q: (0, 0))

    out = pl.pallas_call(
        kernel,
        out_shape=jax.ShapeDtypeStruct((B, C, N), jnp.float32),
        grid_spec=pltpu.PrefetchScalarGridSpec(
            num_scalar_prefetch=0,
            grid=(B, n_q),
            in_specs=[
                pl.BlockSpec((1, C, N), lambda b, q: (b, 0, 0)),   # x (full N, bf16)
                rep((I, C)), rep((I, 1)),                          # w_sa, b_sa
                rep((2 * I, C)), rep((2 * I, 1)),                  # w_gs, b_gs
                rep((C, I)), rep((C, 1)),                          # w_out', b_out'
            ],
            out_specs=pl.BlockSpec((1, C, TQ), lambda b, q: (b, 0, q)),
            scratch_shapes=[
                pltpu.VMEM((I, N), jnp.bfloat16),   # cached guide_attn projection
                pltpu.VMEM((N, I), jnp.bfloat16),   # cached src projection (transposed)
            ],
        ),
        compiler_params=pltpu.CompilerParams(
            dimension_semantics=("parallel", "arbitrary"),
            vmem_limit_bytes=vmem_limit),
    )(x, w_sa, b_sa, w_gs, b_gs, w_out, b_out)

    return out.reshape(B, C, W, H)


def prepare_params(raw):
    """Fuse guide/src projections, fold conv bias + eval BN, cast to bf16."""
    (w_sa, b_sa, w_ga, b_ga, w_sp, b_sp, w_out, b_out,
     gamma, beta, mean, var) = raw
    w_gs = jnp.concatenate([w_ga, w_sp], axis=0)                  # (2I, C)
    b_gs = jnp.concatenate([b_ga, b_sp], axis=0)[:, None]         # (2I, 1)
    scale = gamma * jax.lax.rsqrt(var + BN_EPS)                   # (C,)
    w_out_f = w_out * scale[:, None]                              # (C, I)
    b_out_f = ((b_out - mean) * scale + beta)[:, None]            # (C, 1)
    return (w_sa.astype(jnp.bfloat16), b_sa[:, None].astype(jnp.float32),
            w_gs.astype(jnp.bfloat16), b_gs.astype(jnp.float32),
            w_out_f.astype(jnp.bfloat16), b_out_f.astype(jnp.float32))


def init_params(key, C, scale_factor, zero_init_gamma=False):
    """PyTorch-style init. The module zero-inits BN gamma; the self-test uses
    nonzero gamma/beta/mean/var so the attention path is actually exercised."""
    inter = C // scale_factor
    ks = jax.random.split(key, 12)

    def conv_init(kw, kb, fan_in, fan_out):
        bound = 1.0 / jnp.sqrt(jnp.float32(fan_in))
        w = jax.random.uniform(kw, (fan_out, fan_in), jnp.float32, -bound, bound)
        b = jax.random.uniform(kb, (fan_out,), jnp.float32, -bound, bound)
        return w, b

    w_sa, b_sa = conv_init(ks[0], ks[1], C, inter)
    w_ga, b_ga = conv_init(ks[2], ks[3], C, inter)
    w_sp, b_sp = conv_init(ks[4], ks[5], C, inter)
    w_out, b_out = conv_init(ks[6], ks[7], inter, C)
    if zero_init_gamma:
        gamma = jnp.zeros((C,), jnp.float32)        # matches zero_init=True
    else:
        gamma = 0.5 + jax.random.uniform(ks[8], (C,), jnp.float32)
    beta = 0.1 * jax.random.normal(ks[9], (C,), jnp.float32)
    mean = 0.1 * jax.random.normal(ks[10], (C,), jnp.float32)
    var = 0.5 + jax.random.uniform(ks[11], (C,), jnp.float32)
    return (w_sa, b_sa, w_ga, b_ga, w_sp, b_sp, w_out, b_out,
            gamma, beta, mean, var)


def reference_mirrored(x_nchw, prepped):
    """Pure-JAX reference mirroring the kernel arithmetic (bf16 inputs/matmuls,
    f32 accumulation, bf16 residual, fused/folded params)."""
    w_sa, b_sa, w_gs, b_gs, w_out, b_out = prepped
    B, C, W, H = x_nchw.shape
    N = W * H
    I = w_sa.shape[0]
    x = x_nchw.reshape(B, C, N).astype(jnp.bfloat16)
    x32 = x.astype(jnp.float32)
    sa = jnp.einsum('ic,bcn->bin', w_sa, x,
                    preferred_element_type=jnp.float32) + b_sa
    gs = jnp.einsum('jc,bcn->bjn', w_gs, x,
                    preferred_element_type=jnp.float32) + b_gs
    ga = gs[:, :I, :].astype(jnp.bfloat16)
    sp = gs[:, I:, :].astype(jnp.bfloat16)
    logits = jnp.einsum('bit,bin->btn', sa.astype(jnp.bfloat16), ga,
                        preferred_element_type=jnp.float32)
    attn = jax.nn.softmax(logits, axis=-1).astype(jnp.bfloat16)
    y = jnp.einsum('btn,bin->bti', attn, sp,
                   preferred_element_type=jnp.float32)
    z = jnp.einsum('ci,bti->bct', w_out, y.astype(jnp.bfloat16),
                   preferred_element_type=jnp.float32) + b_out
    out = jnp.maximum(z, 0.0) + x32
    return out.reshape(B, C, W, H)


def reference_f32(x_nchw, raw):
    """Exact f32 reference matching the PyTorch forward (eval-mode BN)."""
    (w_sa, b_sa, w_ga, b_ga, w_sp, b_sp, w_out, b_out,
     gamma, beta, mean, var) = raw
    B, C, W, H = x_nchw.shape
    N = W * H
    xt = jnp.transpose(x_nchw.reshape(B, C, N), (0, 2, 1))        # (B, N, C)
    sa = xt @ w_sa.T + b_sa
    ga = xt @ w_ga.T + b_ga
    sp = xt @ w_sp.T + b_sp
    attn = jax.nn.softmax(jnp.einsum('bni,bmi->bnm', sa, ga), axis=-1)
    y = jnp.einsum('bnm,bmi->bni', attn, sp)
    z = y @ w_out.T + b_out
    zn = (z - mean) * jax.lax.rsqrt(var + BN_EPS) * gamma + beta
    out = jnp.maximum(zn, 0.0) + xt
    return jnp.transpose(out, (0, 2, 1)).reshape(B, C, W, H)


if __name__ == "__main__":
    scale_factor = 2
    key = jax.random.PRNGKey(0)

    # Two small configs: single query tile (N=256) and multi-tile (N=1024),
    # the latter exercises the gs scratch-cache and in-kernel pl.ds slicing.
    for (B, C, W, H) in [(2, 16, 16, 16), (2, 16, 32, 32)]:
        kx, kp, key = jax.random.split(key, 3)
        x = jax.random.normal(kx, (B, C, W, H), jnp.float32)
        raw = init_params(kp, C, scale_factor, zero_init_gamma=False)
        prepped = prepare_params(raw)

        out = jax.block_until_ready(nonlocal_block(x, prepped))
        assert out.shape == (B, C, W, H)

        # Tight check vs. a reference mirroring the kernel arithmetic.
        ref_m = reference_mirrored(x, prepped)
        err_m = float(jnp.max(jnp.abs(out - ref_m)))
        assert err_m < 2e-2, (
            f"mismatch vs mirrored reference {(B, C, W, H)}: {err_m}")

        # Loose sanity check vs. exact-f32 PyTorch semantics (gap is the
        # deliberate bf16 / approx-reciprocal approximation).
        ref_e = reference_f32(x, raw)
        err_e = float(jnp.max(jnp.abs(out - ref_e)))
        tol_e = 0.1 * (1.0 + float(jnp.max(jnp.abs(ref_e))))
        assert err_e < tol_e, (
            f"mismatch vs f32 reference {(B, C, W, H)}: {err_e}")

    print("KERNEL_OK")
</pallas_src>

<mosaic_0001>
module attributes {stable_mosaic.version = 11 : i64} {
  func.func @_nonlocal_kernel(%arg0: i32, %arg1: i32, %arg2: memref<1x16x256xbf16, #tpu.memory_space<vmem>>, %arg3: memref<8x16xbf16, #tpu.memory_space<vmem>>, %arg4: memref<8x1xf32, #tpu.memory_space<vmem>>, %arg5: memref<16x16xbf16, #tpu.memory_space<vmem>>, %arg6: memref<16x1xf32, #tpu.memory_space<vmem>>, %arg7: memref<16x8xbf16, #tpu.memory_space<vmem>>, %arg8: memref<16x1xf32, #tpu.memory_space<vmem>>, %arg9: memref<1x16x256xf32, #tpu.memory_space<vmem>>, %arg10: memref<8x256xbf16, #tpu.memory_space<vmem>>, %arg11: memref<256x8xbf16, #tpu.memory_space<vmem>>) attributes {dimension_semantics = [#tpu.dimension_semantics<parallel>, #tpu.dimension_semantics<arbitrary>], iteration_bounds = array<i64: 2, 1>, scalar_prefetch = 0 : i64, scratch_operands = 2 : i64, tpu.core_type = #tpu.core_type<tc>, window_params = [{transform_indices = @transform_0, window_bounds = array<i64: 1, 16, 256>}, {pipeline_mode = #tpu.pipeline_mode<synchronous>, transform_indices = @transform_1, window_bounds = array<i64: 8, 16>}, {pipeline_mode = #tpu.pipeline_mode<synchronous>, transform_indices = @transform_2, window_bounds = array<i64: 8, 1>}, {pipeline_mode = #tpu.pipeline_mode<synchronous>, transform_indices = @transform_3, window_bounds = array<i64: 16, 16>}, {pipeline_mode = #tpu.pipeline_mode<synchronous>, transform_indices = @transform_4, window_bounds = array<i64: 16, 1>}, {pipeline_mode = #tpu.pipeline_mode<synchronous>, transform_indices = @transform_5, window_bounds = array<i64: 16, 8>}, {pipeline_mode = #tpu.pipeline_mode<synchronous>, transform_indices = @transform_6, window_bounds = array<i64: 16, 1>}, {transform_indices = @transform_7, window_bounds = array<i64: 1, 16, 256>}]} {
    %c0_i32 = arith.constant 0 : i32
    %0 = arith.cmpi eq, %arg1, %c0_i32 : i32
    %1 = arith.extui %0 : i1 to i32
    %c0_i32_0 = arith.constant 0 : i32
    %2 = arith.cmpi ne, %1, %c0_i32_0 : i32
    scf.if %2 {
      %c0_24 = arith.constant 0 : index
      %c0_25 = arith.constant 0 : index
      %40 = vector.load %arg5[%c0_24, %c0_25] : memref<16x16xbf16, #tpu.memory_space<vmem>>, vector<16x16xbf16>
      %c0_26 = arith.constant 0 : index
      %c0_27 = arith.constant 0 : index
      %c0_28 = arith.constant 0 : index
      %41 = vector.load %arg2[%c0_26, %c0_27, %c0_28] : memref<1x16x256xbf16, #tpu.memory_space<vmem>>, vector<1x16x256xbf16>
      %42 = vector.shape_cast %41 : vector<1x16x256xbf16> to vector<16x256xbf16>
      %cst_29 = arith.constant dense<0.000000e+00> : vector<16x256xf32>
      %43 = tpu.matmul %40, %42, %cst_29 {dimension_numbers = #tpu.dot_dimension_numbers<[1], [0], [0], [1], [0, 0, 1, 1], [], []>} : vector<16x16xbf16>, vector<16x256xbf16>, vector<16x256xf32> -> vector<16x256xf32>
      %c0_30 = arith.constant 0 : index
      %c0_31 = arith.constant 0 : index
      %44 = vector.load %arg6[%c0_30, %c0_31] : memref<16x1xf32, #tpu.memory_space<vmem>>, vector<16x1xf32>
      %45 = vector.broadcast %44 : vector<16x1xf32> to vector<16x256xf32>
      %46 = arith.addf %43, %45 : vector<16x256xf32>
      %47 = vector.extract_strided_slice %46 {offsets = [0, 0], sizes = [8, 256], strides = [1, 1]} : vector<16x256xf32> to vector<8x256xf32>
      %48 = arith.truncf %47 : vector<8x256xf32> to vector<8x256xbf16>
      %c0_32 = arith.constant 0 : index
      %c0_33 = arith.constant 0 : index
      %49 = vector.load %arg10[%c0_32, %c0_33] : memref<8x256xbf16, #tpu.memory_space<vmem>>, vector<8x256xbf16>
      tpu.vector_store %arg10[%c0_32, %c0_33], %48 {strides = array<i32>} : memref<8x256xbf16, #tpu.memory_space<vmem>>, vector<8x256xbf16>,
      %50 = vector.extract_strided_slice %46 {offsets = [8, 0], sizes = [8, 256], strides = [1, 1]} : vector<16x256xf32> to vector<8x256xf32>
      %51 = tpu.transpose %50, [1, 0] : vector<8x256xf32> -> vector<256x8xf32>
      %52 = arith.truncf %51 : vector<256x8xf32> to vector<256x8xbf16>
      %c0_34 = arith.constant 0 : index
      %c0_35 = arith.constant 0 : index
      %53 = vector.load %arg11[%c0_34, %c0_35] : memref<256x8xbf16, #tpu.memory_space<vmem>>, vector<256x8xbf16>
      tpu.vector_store %arg11[%c0_34, %c0_35], %52 {strides = array<i32>} : memref<256x8xbf16, #tpu.memory_space<vmem>>, vector<256x8xbf16>,
    } else {
    }
    %c0 = arith.constant 0 : index
    %c0_1 = arith.constant 0 : index
    %c0_2 = arith.constant 0 : index
    %3 = vector.load %arg2[%c0, %c0_1, %c0_2] : memref<1x16x256xbf16, #tpu.memory_space<vmem>>, vector<1x16x256xbf16>
    %4 = vector.shape_cast %3 : vector<1x16x256xbf16> to vector<16x256xbf16>
    %c0_3 = arith.constant 0 : index
    %c0_4 = arith.constant 0 : index
    %5 = vector.load %arg3[%c0_3, %c0_4] : memref<8x16xbf16, #tpu.memory_space<vmem>>, vector<8x16xbf16>
    %cst = arith.constant dense<0.000000e+00> : vector<8x256xf32>
    %6 = tpu.matmul %5, %4, %cst {dimension_numbers = #tpu.dot_dimension_numbers<[1], [0], [0], [1], [0, 0, 1, 1], [], []>} : vector<8x16xbf16>, vector<16x256xbf16>, vector<8x256xf32> -> vector<8x256xf32>
    %c0_5 = arith.constant 0 : index
    %c0_6 = arith.constant 0 : index
    %7 = vector.load %arg4[%c0_5, %c0_6] : memref<8x1xf32, #tpu.memory_space<vmem>>, vector<8x1xf32>
    %8 = vector.broadcast %7 : vector<8x1xf32> to vector<8x256xf32>
    %9 = arith.addf %6, %8 : vector<8x256xf32>
    %10 = tpu.transpose %9, [1, 0] : vector<8x256xf32> -> vector<256x8xf32>
    %11 = arith.truncf %10 : vector<256x8xf32> to vector<256x8xbf16>
    %c0_7 = arith.constant 0 : index
    %c0_8 = arith.constant 0 : index
    %12 = vector.load %arg10[%c0_7, %c0_8] : memref<8x256xbf16, #tpu.memory_space<vmem>>, vector<8x256xbf16>
    %cst_9 = arith.constant dense<0.000000e+00> : vector<256x256xf32>
    %13 = tpu.matmul %11, %12, %cst_9 {dimension_numbers = #tpu.dot_dimension_numbers<[1], [0], [0], [1], [0, 0, 1, 1], [], []>} : vector<256x8xbf16>, vector<8x256xbf16>, vector<256x256xf32> -> vector<256x256xf32>
    %cst_10 = arith.constant dense<0xFF800000> : vector<256xf32>
    %14 = vector.multi_reduction <maximumf>, %13, %cst_10 [1] : vector<256x256xf32> to vector<256xf32>
    %15 = vector.shape_cast %14 : vector<256xf32> to vector<256x1xf32>
    %16 = vector.broadcast %15 : vector<256x1xf32> to vector<256x256xf32>
    %17 = arith.subf %13, %16 : vector<256x256xf32>
    %18 = math.exp %17 : vector<256x256xf32>
    %cst_11 = arith.constant dense<0.000000e+00> : vector<256xf32>
    %19 = vector.multi_reduction <add>, %18, %cst_11 [1] : vector<256x256xf32> to vector<256xf32>
    %20 = vector.shape_cast %19 : vector<256xf32> to vector<256x1xf32>
    %21 = tpu.reciprocal %20 {approx = true} : vector<256x1xf32> -> vector<256x1xf32>
    %22 = vector.broadcast %21 : vector<256x1xf32> to vector<256x256xf32>
    %23 = arith.mulf %18, %22 : vector<256x256xf32>
    %24 = arith.truncf %23 : vector<256x256xf32> to vector<256x256xbf16>
    %c0_12 = arith.constant 0 : index
    %c0_13 = arith.constant 0 : index
    %25 = vector.load %arg11[%c0_12, %c0_13] : memref<256x8xbf16, #tpu.memory_space<vmem>>, vector<256x8xbf16>
    %cst_14 = arith.constant dense<0.000000e+00> : vector<256x8xf32>
    %26 = tpu.matmul %24, %25, %cst_14 {dimension_numbers = #tpu.dot_dimension_numbers<[1], [0], [0], [1], [0, 0, 1, 1], [], []>} : vector<256x256xbf16>, vector<256x8xbf16>, vector<256x8xf32> -> vector<256x8xf32>
    %c0_15 = arith.constant 0 : index
    %c0_16 = arith.constant 0 : index
    %27 = vector.load %arg7[%c0_15, %c0_16] : memref<16x8xbf16, #tpu.memory_space<vmem>>, vector<16x8xbf16>
    %28 = arith.truncf %26 : vector<256x8xf32> to vector<256x8xbf16>
    %cst_17 = arith.constant dense<0.000000e+00> : vector<16x256xf32>
    %29 = tpu.matmul %27, %28, %cst_17 {dimension_numbers = #tpu.dot_dimension_numbers<[1], [1], [0], [0], [0, 0, 1, 0], [], []>} : vector<16x8xbf16>, vector<256x8xbf16>, vector<16x256xf32> -> vector<16x256xf32>
    %c0_18 = arith.constant 0 : index
    %c0_19 = arith.constant 0 : index
    %30 = vector.load %arg8[%c0_18, %c0_19] : memref<16x1xf32, #tpu.memory_space<vmem>>, vector<16x1xf32>
    %31 = vector.broadcast %30 : vector<16x1xf32> to vector<16x256xf32>
    %32 = arith.addf %29, %31 : vector<16x256xf32>
    %cst_20 = arith.constant 0.000000e+00 : f32
    %33 = vector.broadcast %cst_20 : f32 to vector<16x256xf32>
    %34 = arith.maximumf %32, %33 : vector<16x256xf32>
    %35 = arith.extf %4 : vector<16x256xbf16> to vector<16x256xf32>
    %36 = arith.addf %34, %35 : vector<16x256xf32>
    %c0_21 = arith.constant 0 : index
    %c0_22 = arith.constant 0 : index
    %c0_23 = arith.constant 0 : index
    %37 = vector.load %arg9[%c0_21, %c0_22, %c0_23] : memref<1x16x256xf32, #tpu.memory_space<vmem>>, vector<1x16x256xf32>
    %38 = vector.shape_cast %37 : vector<1x16x256xf32> to vector<16x256xf32>
    %39 = vector.shape_cast %36 : vector<16x256xf32> to vector<1x16x256xf32>
    tpu.vector_store %arg9[%c0_21, %c0_22, %c0_23], %39 {strides = array<i32>} : memref<1x16x256xf32, #tpu.memory_space<vmem>>, vector<1x16x256xf32>,
    return
  }
  func.func @transform_0(%arg0: i32, %arg1: i32) -> (i32, i32, i32) {
    %c0_i32 = arith.constant 0 : i32
    %c0_i32_0 = arith.constant 0 : i32
    %c0_i32_1 = arith.constant 0 : i32
    return %arg0, %c0_i32, %c0_i32_0 : i32, i32, i32
  }
  func.func @transform_1(%arg0: i32, %arg1: i32) -> (i32, i32) {
    %c0_i32 = arith.constant 0 : i32
    %c0_i32_0 = arith.constant 0 : i32
    %c0_i32_1 = arith.constant 0 : i32
    return %c0_i32, %c0_i32_0 : i32, i32
  }
  func.func @transform_2(%arg0: i32, %arg1: i32) -> (i32, i32) {
    %c0_i32 = arith.constant 0 : i32
    %c0_i32_0 = arith.constant 0 : i32
    %c0_i32_1 = arith.constant 0 : i32
    return %c0_i32, %c0_i32_0 : i32, i32
  }
  func.func @transform_3(%arg0: i32, %arg1: i32) -> (i32, i32) {
    %c0_i32 = arith.constant 0 : i32
    %c0_i32_0 = arith.constant 0 : i32
    %c0_i32_1 = arith.constant 0 : i32
    return %c0_i32, %c0_i32_0 : i32, i32
  }
  func.func @transform_4(%arg0: i32, %arg1: i32) -> (i32, i32) {
    %c0_i32 = arith.constant 0 : i32
    %c0_i32_0 = arith.constant 0 : i32
    %c0_i32_1 = arith.constant 0 : i32
    return %c0_i32, %c0_i32_0 : i32, i32
  }
  func.func @transform_5(%arg0: i32, %arg1: i32) -> (i32, i32) {
    %c0_i32 = arith.constant 0 : i32
    %c0_i32_0 = arith.constant 0 : i32
    %c0_i32_1 = arith.constant 0 : i32
    return %c0_i32, %c0_i32_0 : i32, i32
  }
  func.func @transform_6(%arg0: i32, %arg1: i32) -> (i32, i32) {
    %c0_i32 = arith.constant 0 : i32
    %c0_i32_0 = arith.constant 0 : i32
    %c0_i32_1 = arith.constant 0 : i32
    return %c0_i32, %c0_i32_0 : i32, i32
  }
  func.func @transform_7(%arg0: i32, %arg1: i32) -> (i32, i32, i32) {
    %c0_i32 = arith.constant 0 : i32
    %c0_i32_0 = arith.constant 0 : i32
    return %arg0, %c0_i32, %arg1 : i32, i32, i32
  }
}

</mosaic_0001>

<bundles_post_ra>
// kernel: tpu_custom_call.1
= control target key start
LH: loop header
LB: loop body
LE: loop exit
PB: predicated region body
PF: predicated region fallthrough
CT: control target
= control target key end

     0   :  { %12 = vsyncpa [#allocation5], 0  ;;  %s3639_s0 = inlined_call_operand.vmem [shape: bf16[2,16,256], index: 0, kind: input, shape index: {}]   ;;  %s3640_s1 = inlined_call_operand.vmem [shape: bf16[8,16], index: 1, kind: input, shape index: {}]   ;;  %s3641_s2 = inlined_call_operand.vmem [shape: f32[8,1], index: 2, kind: input, shape index: {}]   ;;  %s3642_s3 = inlined_call_operand.vmem [shape: bf16[16,16], index: 3, kind: input, shape index: {}]   ;;  %s3643_s4 = inlined_call_operand.vmem [shape: f32[16,1], index: 4, kind: input, shape index: {}]   ;;  %s3644_s5 = inlined_call_operand.vmem [shape: bf16[16,8], index: 5, kind: input, shape index: {}]   ;;  %s3645_s6 = inlined_call_operand.vmem [shape: f32[16,1], index: 6, kind: input, shape index: {}]   ;;  %s3646_s7 = inlined_call_operand.hbm [shape: f32[2,16,256], index: 7, kind: output, shape index: {}]  }
   0x1   :  { %14 = vsyncpa [#allocation5 + $0x1], 0  ;;  %s2787_s24 = smov 0   ;;  %s2789_s25 = smov 0  }
   0x2   :  { %s2791_s26 = smov 0   ;;  %s2793_s27 = smov 0  }
   0x3   :  { %s2795_s28 = smov 0   ;;  %s2797_s29 = smov 0  }
   0x4 LB: > { %s2043_s30 = sadd.s32 4294967295, %s2741_s29   ;;  %s2044_s8 = sadd.s32 4294967294, %s2741_s29   ;;  %s2741_s29 = sphi %s2797_s29, %s20_s29   ;;  %s2737_s28 = sphi %s2795_s28, %s3741_s28   ;;  %s2733_s27 = sphi %s2793_s27, %s3740_s27   ;;  %s2729_s26 = sphi %s2791_s26, %s3739_s26   ;;  %s2725_s25 = sphi %s2789_s25, %s3738_s25   ;;  %s2721_s24 = sphi %s2787_s24, %s3737_s24  }
   0x5   : > { %s32_s9 = sadd.s32 1, %s2737_s28  ;;  %s193_s10 = sadd.s32 1, %s2729_s26 }
   0x6   : > { %p34_p0 = scmp.ge.s32.totalorder %s32_s9, 2  ;;  %p203_p1 = scmp.ne.s32.totalorder %s2729_s26, %s2725_s25 }
   0x7   : > { %p204_p2 = scmp.eq.s32.totalorder %s2043_s30, 1  ;;  %p209_p3 = scmp.ne.s32.totalorder %s2725_s25, %s2721_s24 }
   0x8   : > { %s3743_s9 = smov (%p34_p0, %s32_s9), 0  ;;  %p210_p5 = scmp.eq.s32.totalorder %s2044_s8, 1 }
   0x9   : > { %p2827_p4 = por %p204_p2, %p203_p1  ;;  %s188_s12 = ssub.s32 %s2737_s28, %s3743_s9 }
   0xa   : > { %p2047_p6 = scmp.ge.s32.totalorder %s2741_s29, 1  ;;  %p191_p7 = scmp.eq.s32.totalorder %s188_s12, 0 }
   0xb   : > { %p2834_p8 = por %p210_p5, %p209_p3  ;;  %p254_p9 = scmp.lt.s32.totalorder %s2741_s29, 3 }
   0xc   : > { %s2840_s14 = scalar_select %p191_p7, %s2729_s26, %s193_s10  }
   0xd   : > { %p255_p10 = pnand %p2047_p6, %p254_p9 }
   0xf   : > { %258 = sbr.rel (%p255_p10) target bundleno = 1608 (0x648), region = 48 }
  0x14   : > { %p286_p11 = scmp.lt.s32.totalorder %s2733_s27, 1  ;;  %v2743_v0 = vmov 0   ;;  %v612_v1 = vld [vmem:[%s3641_s2] sm:$0xff]  ;;  %v302_v7 = vld [vmem:[%s3643_s4 + $0x8] sm:$0xff]  ;;  %vm328_vm0 = vcmask 130048   ;;  %vm808_vm1 = vcmask 1043456  }
  0x15   : > { %364 = vmatprep.mubr.bf16.mxu0 %v2743_v0  ;;  %2367 = vset.pattern.permute.xlu0 %v2743_v0  ;;  %v301_v2 = vld [vmem:[%s3643_s4] sm:$0xff]  ;;  %vm759_vm2 = vcmask 64512   ;;  %vm576_vm3 = vcmask 60416   ;;  %s283_s30 = sand.u32 1, %s2725_s25   ;;  %s2167_s15 = sshll.u32 %s2733_s27, 9 }
  0x16   : > { %s287_s17 = scalar_select %p286_p11, %s2733_s27, 1  ;;  %615 = vperm.xlu0 %2367, %v612_v1   ;;  %v2453_v8 = vld [vmem:[%s3642_s3] sm:$0xff]  }
  0x17   : > { %v611_v9 = vld [vmem:[%s3640_s1] sm:$0xf]  ;;  %s2048_s8 = sshll.u32 %s283_s30, 5  ;;  %s3594_s18 = scalar_lea.sflag [#allocation5], %s283_s30 }
  0x18   : > { %s2133_s20 = sshll.u32 %s287_s17, 4  ;;  %s285_s10 = scalar_lea.vmem [#allocation4], %s2048_s8 }
  0x19   : > { %s2855_s23 = scalar_lea.vmem %s3639_s0, %s2133_s20  ;;  %s1970_s12 = sshll.u32 %s285_s10, 4  ;;  %s3585_s12 = int_to_ptr.vmem [resolvable:$true] %s1970_s12 }
  0x1a   : > { %v299_v3 = vld [vmem:[%s2855_s23] sm:$0xff]  ;;  %v300_v4 = vld [vmem:[%s2855_s23 + $0x8] sm:$0xff]  ;;  %305 = vperm.xlu0 %2367, %v301_v2   ;;  %s3590_s17 = scalar_lea.hbm %s3646_s7, %s2167_s15  ;;  %s2665_s27 = scalar_lea.vmem %s3585_s12, 512 }
  0x1b   : > { %v2053_v5 = vcombine.high %v299_v3, %v300_v4  ;;  %v2052_v6 = vcombine.low %v299_v3, %v300_v4  ;;  %p2666_p12 = scmp.ne.s32.totalorder %s3585_s12, %s2665_s27  ;;  %s2744_s19 = smov [#allocation4]  }
  0x1c   : > { %s2669_s20 = sshll.u32 %s2744_s19, 4  ;;  %s2670_s20 = int_to_ptr.vmem [resolvable:$false] %s2669_s20 }
  0x1d   : > { %346 = vmatprep.subr.bf16.mxu0 %v2053_v5  ;;  %p2667_p13 = pnand %p2666_p12, %p2827_p4  ;;  %s2671_s21 = scalar_lea.vmem %s2670_s20, 1024 }
  0x1e   : > { %347 = vmatpush1.bf16.msra.mxu0 %v2052_v6  ;;  %310 = vperm.xlu0 %2367, %v302_v7   ;;  %p2672_p1 = scmp.lt.s32.totalorder %s3585_s12, %s2670_s20  ;;  %p2673_p2 = scmp.lt.s32.totalorder %s2671_s21, %s2665_s27 }
  0x1f   : > { %646 = vmatprep.subr.bf16.mxu0 %v2053_v5  ;;  %p2668_p0 = pneg %p2667_p13 }
  0x20   : > { %p2674_p3 = por %p2673_p2, %p2672_p1 }
  0x21   : > { %2054 = vmatmul.mubr.msk.bf16.vlgmr.msra.gmra.mxu0 %vm328_vm0, %v2453_v8 }
  0x22   : > { %647 = vmatpush1.bf16.msra.mxu0 %v2052_v6  ;;  %664 = vmatprep.mubr.bf16.mxu0 %v2743_v0  ;;  %p2675_p5 = pnand %p2674_p3, %p2668_p0 }
  0x29   : > { %2090 = vmatmul.mubr.msk.bf16.vlgmr.msra.gmra.mxu0 %vm328_vm0, %v611_v9 }
  0x2a   : > { %847 = vmatprep.mubr.bf16.mxu0 %v2743_v0 }
  0x91   : > { %v616_v10 = vpop.permute.xlu0 %615 }
  0x95   : > { %v306_v11 = vpop.permute.xlu0 %305 }
  0x99   : > { %v311_v17 = vpop.permute.xlu0 %310 }
  0xe1   : > { %v366_v12 = vpop.f32.mrf.mxu0 }
  0xe2   : > { %v367_v13 = vadd.f32 %v366_v12, %v306_v11 }
  0xe3   : > { %v368_v14 = vpop.f32.mrf.mxu0 }
  0xe4   : > { %v2168_v15 = vpack.c.bf16 %v367_v13, %v367_v13  ;;  %v369_v16 = vadd.f32 %v368_v14, %v306_v11 }
  0xe5   : > { %v370_v18 = vpop.f32.mrf.mxu0 }
  0xe6   : > { %v2169_v19 = vpack.c.bf16 %v369_v16, %v369_v16  ;;  %v810_v21 = vsel %vm808_vm1, %v2168_v15, 0  ;;  %v2870_v22 = vadd.f32 %v370_v18, %v311_v17 }
  0xe7   : > { %v372_v20 = vpop.f32.mrf.mxu0 }
  0xe8   : > { %v2872_v23 = vadd.f32 %v372_v20, %v311_v17  ;;  %2093 = vmatprep.subr.msk.bf16.mxu0 %vm808_vm1, %v2169_v19 }
  0xe9   : > { %v666_v24 = vpop.f32.mrf.mxu0  ;;  %830 = vmatpush1.bf16.msra.mxu0 %v810_v21 }
  0xea   : > { %v667_v26 = vadd.f32 %v666_v24, %v616_v10 }
  0xeb   : > { %v668_v27 = vpop.f32.mrf.mxu0 }
  0xec   : > { %673 = vxpose.xlu1.b32.start.end [1/1] (short) %v667_v26, 128  ;;  %v669_v30 = vadd.f32 %v668_v27, %v616_v10 }
  0xed   : > { %v670_v28 = vpop.f32.mrf.mxu0 }
  0xef   : > { %v671_v29 = vpop.f32.mrf.mxu0 }
 0x129   : > { %705 = vxpose.xlu1.b32.start.end [1/1] (short) %v669_v30, 128 }
 0x147   : > { %2450 = vset.pattern.permute.xlu1 %v2743_v0 }
 0x168   : > { %v689_v31 = vpop.trf.xlu1 }
 0x16c   : > { %v690_v32 = vpop.trf.xlu1 }
 0x16d   : > { %v737_v33 = vpack.c.bf16 %v690_v32, %v689_v31 }
 0x16f   : > { %2094 = vmatmul.mubr.msk.bf16.vlgmr.msra.gmra.mxu0 %vm759_vm2, %v737_v33 }
 0x170   : > { %v691_v34 = vpop.trf.xlu1  ;;  %857 = vmatprep.mubr.bf16.mxu0 %v2743_v0 }
 0x174   : > { %v692_v35 = vpop.trf.xlu1 }
 0x175   : > { %v738_v36 = vpack.c.bf16 %v692_v35, %v691_v34 }
 0x177   : > { %2095 = vmatmul.mubr.msk.bf16.gmra.mxu0 %vm759_vm2, %v738_v36 }
 0x178   : > { %v693_v37 = vpop.trf.xlu1  ;;  %867 = vmatprep.mubr.bf16.mxu0 %v2743_v0 }
 0x17c   : > { %v694_v38 = vpop.trf.xlu1 }
 0x17d   : > { %v739_v39 = vpack.c.bf16 %v694_v38, %v693_v37 }
 0x17f   : > { %2096 = vmatmul.mubr.msk.bf16.gmra.mxu0 %vm759_vm2, %v739_v39 }
 0x180   : > { %v695_v40 = vpop.trf.xlu1  ;;  %877 = vmatprep.mubr.bf16.mxu0 %v2743_v0 }
 0x184   : > { %v696_v41 = vpop.trf.xlu1 }
 0x185   : > { %v740_v42 = vpack.c.bf16 %v696_v41, %v695_v40 }
 0x187   : > { %2097 = vmatmul.mubr.msk.bf16.gmra.mxu0 %vm759_vm2, %v740_v42 }
 0x188   : > { %v697_v43 = vpop.trf.xlu1  ;;  %887 = vmatprep.mubr.bf16.mxu0 %v2743_v0 }
 0x18c   : > { %v698_v44 = vpop.trf.xlu1 }
 0x18d   : > { %v741_v45 = vpack.c.bf16 %v698_v44, %v697_v43 }
 0x18f   : > { %2098 = vmatmul.mubr.msk.bf16.gmra.mxu0 %vm759_vm2, %v741_v45 }
 0x190   : > { %v699_v46 = vpop.trf.xlu1  ;;  %897 = vmatprep.mubr.bf16.mxu0 %v2743_v0 }
 0x194   : > { %v700_v47 = vpop.trf.xlu1 }
 0x195   : > { %v742_v48 = vpack.c.bf16 %v700_v47, %v699_v46 }
 0x197   : > { %2099 = vmatmul.mubr.msk.bf16.gmra.mxu0 %vm759_vm2, %v742_v48 }
 0x198   : > { %v701_v49 = vpop.trf.xlu1  ;;  %907 = vmatprep.mubr.bf16.mxu0 %v2743_v0 }
 0x19c   : > { %v702_v50 = vpop.trf.xlu1 }
 0x19d   : > { %v743_v51 = vpack.c.bf16 %v702_v50, %v701_v49 }
 0x19f   : > { %2100 = vmatmul.mubr.msk.bf16.gmra.mxu0 %vm759_vm2, %v743_v51 }
 0x1a0   : > { %v703_v52 = vpop.trf.xlu1  ;;  %917 = vmatprep.mubr.bf16.mxu0 %v2743_v0 }
 0x1a4   : > { %v704_v53 = vpop.trf.xlu1 }
 0x1a5   : > { %v744_v54 = vpack.c.bf16 %v704_v53, %v703_v52 }
 0x1a7   : > { %2101 = vmatmul.mubr.msk.bf16.gmra.mxu0 %vm759_vm2, %v744_v54 }
 0x1a8   : > { %v721_v55 = vpop.trf.xlu1  ;;  %927 = vmatprep.mubr.bf16.mxu0 %v2743_v0 }
 0x1ac   : > { %v722_v56 = vpop.trf.xlu1 }
 0x1ad   : > { %v745_v57 = vpack.c.bf16 %v722_v56, %v721_v55 }
 0x1af   : > { %2102 = vmatmul.mubr.msk.bf16.gmra.mxu0 %vm759_vm2, %v745_v57 }
 0x1b0   : > { %v723_v58 = vpop.trf.xlu1  ;;  %937 = vmatprep.mubr.bf16.mxu0 %v2743_v0 }
 0x1b4   : > { %v724_v59 = vpop.trf.xlu1 }
 0x1b5   : > { %v746_v60 = vpack.c.bf16 %v724_v59, %v723_v58 }
 0x1b7   : > { %2103 = vmatmul.mubr.msk.bf16.gmra.mxu0 %vm759_vm2, %v746_v60 }
 0x1b8   : > { %v725_v61 = vpop.trf.xlu1  ;;  %947 = vmatprep.mubr.bf16.mxu0 %v2743_v0 }
 0x1bc   : > { %v726_v62 = vpop.trf.xlu1 }
 0x1bd   : > { %v747_v63 = vpack.c.bf16 %v726_v62, %v725_v61 }
 0x1bf   : > { %2104 = vmatmul.mubr.msk.bf16.gmra.mxu0 %vm759_vm2, %v747_v63 }
 0x1c0   : > { %v727_v1 = vpop.trf.xlu1  ;;  %957 = vmatprep.mubr.bf16.mxu0 %v2743_v0 }
 0x1c4   : > { %v728_v2 = vpop.trf.xlu1 }
 0x1c5   : > { %v748_v3 = vpack.c.bf16 %v728_v2, %v727_v1 }
 0x1c7   : > { %2105 = vmatmul.mubr.msk.bf16.gmra.mxu0 %vm759_vm2, %v748_v3 }
 0x1c8   : > { %v729_v4 = vpop.trf.xlu1  ;;  %967 = vmatprep.mubr.bf16.mxu0 %v2743_v0 }
 0x1cc   : > { %v730_v5 = vpop.trf.xlu1 }
 0x1cd   : > { %v749_v6 = vpack.c.bf16 %v730_v5, %v729_v4 }
 0x1cf   : > { %2106 = vmatmul.mubr.msk.bf16.gmra.mxu0 %vm759_vm2, %v749_v6 }
 0x1d0   : > { %v731_v7 = vpop.trf.xlu1  ;;  %977 = vmatprep.mubr.bf16.mxu0 %v2743_v0 }
 0x1d4   : > { %v732_v8 = vpop.trf.xlu1 }
 0x1d5   : > { %v750_v9 = vpack.c.bf16 %v732_v8, %v731_v7 }
 0x1d7   : > { %2107 = vmatmul.mubr.msk.bf16.gmra.mxu0 %vm759_vm2, %v750_v9 }
 0x1d8   : > { %v733_v10 = vpop.trf.xlu1  ;;  %987 = vmatprep.mubr.bf16.mxu0 %v2743_v0 }
 0x1dc   : > { %v734_v11 = vpop.trf.xlu1 }
 0x1dd   : > { %v751_v12 = vpack.c.bf16 %v734_v11, %v733_v10 }
 0x1df   : > { %2108 = vmatmul.mubr.msk.bf16.gmra.mxu0 %vm759_vm2, %v751_v12 }
 0x1e0   : > { %v735_v13 = vpop.trf.xlu1  ;;  %997 = vmatprep.mubr.bf16.mxu0 %v2743_v0 }
 0x1e4   : > { %v736_v14 = vpop.trf.xlu1 }
 0x1e5   : > { %v752_v15 = vpack.c.bf16 %v736_v14, %v735_v13 }
 0x1e7   : > { %2109 = vmatmul.mubr.msk.bf16.gmra.mxu0 %vm759_vm2, %v752_v15 }
 0x22f   : > { %v2908_v16 = vpop.f32.mrf.mxu0 }
 0x231   : > { %v2910_v17 = vpop.f32.mrf.mxu0 }
 0x232   : > { %v1008_v18 = vmax.f32 %v2908_v16, %v2910_v17 }
 0x233   : > { %v2914_v19 = vpop.f32.mrf.mxu0 }
 0x234   : > { %1009 = vmax.xlane.f32.xlu0 %v1008_v18 }
 0x235   : > { %v2916_v20 = vpop.f32.mrf.mxu0 }
 0x236   : > { %v1011_v21 = vmax.f32 %v2914_v19, %v2916_v20 }
 0x237   : > { %v2920_v0 = vpop.f32.mrf.mxu0 }
 0x238   : > { %1012 = vmax.xlane.f32.xlu0 %v1011_v21 }
 0x239   : > { %v2922_v24 = vpop.f32.mrf.mxu0 }
 0x23a   : > { %v1014_v26 = vmax.f32 %v2920_v0, %v2922_v24 }
 0x23b   : > { %v2926_v27 = vpop.f32.mrf.mxu0 }
 0x23c   : > { %1015 = vmax.xlane.f32.xlu0 %v1014_v26 }
 0x23d   : > { %v2928_v28 = vpop.f32.mrf.mxu0 }
 0x23e   : > { %v1017_v29 = vmax.f32 %v2926_v27, %v2928_v28 }
 0x23f   : > { %v2932_v30 = vpop.f32.mrf.mxu0 }
 0x240   : > { %1018 = vmax.xlane.f32.xlu1 %v1017_v29 }
 0x241   : > { %v2934_v31 = vpop.f32.mrf.mxu0 }
 0x242   : > { %v1020_v32 = vmax.f32 %v2932_v30, %v2934_v31 }
 0x243   : > { %v2938_v33 = vpop.f32.mrf.mxu0 }
 0x244   : > { %1021 = vmax.xlane.f32.xlu0 %v1020_v32 }
 0x245   : > { %v2940_v34 = vpop.f32.mrf.mxu0 }
 0x246   : > { %v1023_v35 = vmax.f32 %v2938_v33, %v2940_v34 }
 0x247   : > { %v2944_v36 = vpop.f32.mrf.mxu0 }
 0x248   : > { %1024 = vmax.xlane.f32.xlu0 %v1023_v35 }
 0x249   : > { %v2946_v37 = vpop.f32.mrf.mxu0 }
 0x24a   : > { %v1026_v38 = vmax.f32 %v2944_v36, %v2946_v37 }
 0x24b   : > { %v2950_v39 = vpop.f32.mrf.mxu0 }
 0x24c   : > { %1027 = vmax.xlane.f32.xlu0 %v1026_v38 }
 0x24d   : > { %v2952_v40 = vpop.f32.mrf.mxu0 }
 0x24e   : > { %v1029_v41 = vmax.f32 %v2950_v39, %v2952_v40 }
 0x24f   : > { %v2956_v42 = vpop.f32.mrf.mxu0 }
 0x250   : > { %1030 = vmax.xlane.f32.xlu0 %v1029_v41 }
 0x251   : > { %v2958_v43 = vpop.f32.mrf.mxu0 }
 0x252   : > { %v1032_v44 = vmax.f32 %v2956_v42, %v2958_v43 }
 0x253   : > { %v2962_v45 = vpop.f32.mrf.mxu0 }
 0x254   : > { %1033 = vmax.xlane.f32.xlu0 %v1032_v44 }
 0x255   : > { %v2964_v46 = vpop.f32.mrf.mxu0 }
 0x256   : > { %v1035_v47 = vmax.f32 %v2962_v45, %v2964_v46 }
 0x257   : > { %v2968_v48 = vpop.f32.mrf.mxu0 }
 0x258   : > { %1036 = vmax.xlane.f32.xlu0 %v1035_v47 }
 0x259   : > { %v2970_v49 = vpop.f32.mrf.mxu0 }
 0x25a   : > { %v1038_v50 = vmax.f32 %v2968_v48, %v2970_v49 }
 0x25b   : > { %v2974_v51 = vpop.f32.mrf.mxu0 }
 0x25c   : > { %1039 = vmax.xlane.f32.xlu0 %v1038_v50 }
 0x25d   : > { %v2976_v52 = vpop.f32.mrf.mxu0 }
 0x25e   : > { %v1041_v53 = vmax.f32 %v2974_v51, %v2976_v52 }
 0x25f   : > { %v2980_v54 = vpop.f32.mrf.mxu0 }
 0x260   : > { %1042 = vmax.xlane.f32.xlu0 %v1041_v53 }
 0x261   : > { %v2982_v55 = vpop.f32.mrf.mxu0 }
 0x262   : > { %v1044_v56 = vmax.f32 %v2980_v54, %v2982_v55 }
 0x263   : > { %v2986_v57 = vpop.f32.mrf.mxu0 }
 0x264   : > { %1045 = vmax.xlane.f32.xlu0 %v1044_v56 }
 0x265   : > { %v2988_v58 = vpop.f32.mrf.mxu0 }
 0x266   : > { %v1047_v59 = vmax.f32 %v2986_v57, %v2988_v58 }
 0x267   : > { %v2992_v60 = vpop.f32.mrf.mxu0 }
 0x268   : > { %1048 = vmax.xlane.f32.xlu0 %v1047_v59 }
 0x269   : > { %v2994_v61 = vpop.f32.mrf.mxu0 }
 0x26a   : > { %v1050_v62 = vmax.f32 %v2992_v60, %v2994_v61 }
 0x26b   : > { %v2998_v63 = vpop.f32.mrf.mxu0 }
 0x26c   : > { %1051 = vmax.xlane.f32.xlu0 %v1050_v62 }
 0x26d   : > { %v3000_v1 = vpop.f32.mrf.mxu0 }
 0x26e   : > { %v1053_v2 = vmax.f32 %v2998_v63, %v3000_v1 }
 0x26f   : > { %v3004_v3 = vpop.f32.mrf.mxu0 }
 0x270   : > { %1054 = vmax.xlane.f32.xlu0 %v1053_v2 }
 0x271   : > { %v3006_v4 = vpop.f32.mrf.mxu0 }
 0x272   : > { %v1056_v5 = vmax.f32 %v3004_v3, %v3006_v4 }
 0x273   : > { %v3010_v6 = vpop.f32.mrf.mxu0 }
 0x274   : > { %1057 = vmax.xlane.f32.xlu0 %v1056_v5 }
 0x275   : > { %v3012_v7 = vpop.f32.mrf.mxu0 }
 0x276   : > { %v1059_v8 = vmax.f32 %v3010_v6, %v3012_v7 }
 0x277   : > { %v3016_v9 = vpop.f32.mrf.mxu0 }
 0x278   : > { %1060 = vmax.xlane.f32.xlu0 %v1059_v8 }
 0x279   : > { %v3018_v10 = vpop.f32.mrf.mxu0 }
 0x27a   : > { %v1062_v11 = vmax.f32 %v3016_v9, %v3018_v10 }
 0x27b   : > { %v3022_v12 = vpop.f32.mrf.mxu0 }
 0x27c   : > { %1063 = vmax.xlane.f32.xlu1 %v1062_v11 }
 0x27d   : > { %v3024_v13 = vpop.f32.mrf.mxu0 }
 0x27e   : > { %v1065_v14 = vmax.f32 %v3022_v12, %v3024_v13 }
 0x27f   : > { %v3028_v15 = vpop.f32.mrf.mxu0 }
 0x280   : > { %1066 = vmax.xlane.f32.xlu1 %v1065_v14 }
 0x281   : > { %v3030_v18 = vpop.f32.mrf.mxu0 }
 0x282   : > { %v1068_v21 = vmax.f32 %v3028_v15, %v3030_v18 }
 0x283   : > { %v3034_v26 = vpop.f32.mrf.mxu0 }
 0x284   : > { %1069 = vmax.xlane.f32.xlu1 %v1068_v21 }
 0x285   : > { %v3036_v29 = vpop.f32.mrf.mxu0 }
 0x286   : > { %v1071_v32 = vmax.f32 %v3034_v26, %v3036_v29 }
 0x287   : > { %v3040_v35 = vpop.f32.mrf.mxu0 }
 0x288   : > { %1072 = vmax.xlane.f32.xlu1 %v1071_v32 }
 0x289   : > { %v3042_v38 = vpop.f32.mrf.mxu0 }
 0x28a   : > { %v1074_v41 = vmax.f32 %v3040_v35, %v3042_v38 }
 0x28b   : > { %v3046_v44 = vpop.f32.mrf.mxu0 }
 0x28c   : > { %1075 = vmax.xlane.f32.xlu1 %v1074_v41 }
 0x28d   : > { %v3048_v47 = vpop.f32.mrf.mxu0 }
 0x28e   : > { %v1077_v50 = vmax.f32 %v3046_v44, %v3048_v47 }
 0x28f   : > { %v3052_v53 = vpop.f32.mrf.mxu0 }
 0x290   : > { %3678 = vst [vmem:[#allocation7_spill] sm:$0xff] %v3052_v53  ;;  %1078 = vmax.xlane.f32.xlu1 %v1077_v50 }
 0x291   : > { %v3054_v56 = vpop.f32.mrf.mxu0 }
 0x292   : > { %3679 = vst [vmem:[#allocation8_spill] sm:$0xff] %v3054_v56  ;;  %v1080_v59 = vmax.f32 %v3052_v53, %v3054_v56 }
 0x293   : > { %v3058_v62 = vpop.f32.mrf.mxu0 }
 0x294   : > { %1081 = vmax.xlane.f32.xlu1 %v1080_v59 }
 0x295   : > { %v3060_v2 = vpop.f32.mrf.mxu0 }
 0x297   : > { %v3062_v5 = vpop.f32.mrf.mxu0 }
 0x298   : > { %3680 = vst [vmem:[#allocation9_spill] sm:$0xff] %v3062_v5 }
 0x299   : > { %v3064_v8 = vpop.f32.mrf.mxu0 }
 0x29a   : > { %3681 = vst [vmem:[#allocation10_spill] sm:$0xff] %v3064_v8  ;;  %v1086_v11 = vmax.f32 %v3062_v5, %v3064_v8  ;;  %v3687_v8 = vpack.i.bf16 %v2870_v22, %v2872_v23 }
 0x29b   : > { %v3068_v14 = vpop.f32.mrf.mxu0 }
 0x29c   : > { %3682 = vst [vmem:[#allocation11_spill] sm:$0xff] %v3068_v14  ;;  %1087 = vmax.xlane.f32.xlu1 %v1086_v11 }
 0x29d   : > { %v3070_v21 = vpop.f32.mrf.mxu0 }
 0x29e   : > { %3683 = vst [vmem:[#allocation12_spill] sm:$0xff] %v3070_v21  ;;  %v1089_v32 = vmax.f32 %v3068_v14, %v3070_v21 }
 0x29f   : > { %v3074_v41 = vpop.f32.mrf.mxu0 }
 0x2a0   : > { %3684 = vst [vmem:[#allocation13_spill] sm:$0xff] %v3074_v41  ;;  %1090 = vmax.xlane.f32.xlu1 %v1089_v32 }
 0x2a1   : > { %v3076_v50 = vpop.f32.mrf.mxu0 }
 0x2a2   : > { %3685 = vst [vmem:[#allocation14_spill] sm:$0xff] %v3076_v50  ;;  %v1092_v59 = vmax.f32 %v3074_v41, %v3076_v50 }
 0x2a3   : > { %v3080_v25 = vpop.f32.mrf.mxu0 }
 0x2a4   : > { %3686 = vst [vmem:[#allocation15_spill] sm:$0xff] %v3080_v25  ;;  %1093 = vmax.xlane.f32.xlu1 %v1092_v59 }
 0x2a5   : > { %2369 = vxpose.xlu0.b32.start.end [1/1] (short) %v3687_v8, 128  ;;  %v3085_v11 = vpop.f32.mrf.mxu0 }
 0x2a6   : > { %3688 = vst [vmem:[#allocation16_spill] sm:$0xff] %v3085_v11  ;;  %v1095_v21 = vmax.f32 %v3080_v25, %v3085_v11 }
 0x2a7   : > { %v3089_v14 = vpop.f32.mrf.mxu0 }
 0x2a8   : > { %3689 = vst [vmem:[#allocation17_spill] sm:$0xff] %v3089_v14  ;;  %1096 = vmax.xlane.f32.xlu1 %v1095_v21 }
 0x2a9   : > { %v3091_v32 = vpop.f32.mrf.mxu0 }
 0x2aa   : > { %3690 = vst [vmem:[#allocation18_spill] sm:$0xff] %v3091_v32  ;;  %v1098_v50 = vmax.f32 %v3089_v14, %v3091_v32 }
 0x2ab   : > { %v3095_v41 = vpop.f32.mrf.mxu0 }
 0x2ac   : > { %1099 = vmax.xlane.f32.xlu1 %v1098_v50 }
 0x2ad   : > { %v3097_v59 = vpop.f32.mrf.mxu0 }
 0x2ae   : > { %3691 = vst [vmem:[#allocation19_spill] sm:$0xff] %v3097_v59  ;;  %v1101_v22 = vmax.f32 %v3095_v41, %v3097_v59 }
 0x2b0   : > { %1102 = vmax.xlane.f32.xlu1 %v1101_v22 }
 0x2bd   : > { %v1010_v23 = vpop.xlane.xlu0 %1009 }
 0x2be   : > { %v1104_v8 = vsub.f32 %v2908_v16, %v1010_v23  ;;  %v1105_v11 = vsub.f32 %v2910_v17, %v1010_v23 }
 0x2c0   : > { %v1168_v21 = vmul.f32 1.442695, %v1104_v8  ;;  %v1170_v25 = vmul.f32 1.442695, %v1105_v11 }
 0x2c1   : > { %v1013_v5 = vpop.xlane.xlu0 %1012 }
 0x2c2   : > { %2471 = vpow2.f32 %v1168_v21  ;;  %v1106_v32 = vsub.f32 %v2914_v19, %v1013_v5  ;;  %v1107_v14 = vsub.f32 %v2916_v20, %v1013_v5 }
 0x2c3   : > { %2473 = vpow2.f32 %v1170_v25 }
 0x2c4   : > { %v1172_v50 = vmul.f32 1.442695, %v1106_v32  ;;  %v1174_v56 = vmul.f32 1.442695, %v1107_v14 }
 0x2c5   : > { %v1016_v53 = vpop.xlane.xlu0 %1015 }
 0x2c6   : > { %2475 = vpow2.f32 %v1172_v50  ;;  %v1108_v22 = vsub.f32 %v2920_v0, %v1016_v53  ;;  %v1109_v59 = vsub.f32 %v2922_v24, %v1016_v53 }
 0x2c7   : > { %2477 = vpow2.f32 %v1174_v56 }
 0x2c8   : > { %v1176_v16 = vmul.f32 1.442695, %v1108_v22  ;;  %v1178_v17 = vmul.f32 1.442695, %v1109_v59 }
 0x2c9   : > { %v1019_v23 = vpop.xlane.xlu1 %1018 }
 0x2ca   : > { %2479 = vpow2.f32 %v1176_v16  ;;  %v1110_v11 = vsub.f32 %v2926_v27, %v1019_v23  ;;  %v1111_v19 = vsub.f32 %v2928_v28, %v1019_v23 }
 0x2cb   : > { %2481 = vpow2.f32 %v1178_v17 }
 0x2cc   : > { %v1180_v20 = vmul.f32 1.442695, %v1110_v11  ;;  %v1182_v25 = vmul.f32 1.442695, %v1111_v19 }
 0x2cd   : > { %v1022_v5 = vpop.xlane.xlu0 %1021 }
 0x2ce   : > { %2483 = vpow2.f32 %v1180_v20  ;;  %v1112_v14 = vsub.f32 %v2932_v30, %v1022_v5  ;;  %v1113_v0 = vsub.f32 %v2934_v31, %v1022_v5 }
 0x2cf   : > { %v3111_v32 = vpop.eup %2471  ;;  %2485 = vpow2.f32 %v1182_v25 }
 0x2d0   : > { %v3113_v24 = vpop.eup %2473  ;;  %v1184_v53 = vmul.f32 1.442695, %v1112_v14  ;;  %v1186_v56 = vmul.f32 1.442695, %v1113_v0 }
 0x2d1   : > { %v1025_v59 = vpop.xlane.xlu0 %1024  ;;  %v1296_v27 = vadd.f32 %v3113_v24, %v3111_v32 }
 0x2d2   : > { %2487 = vpow2.f32 %v1184_v53  ;;  %v1114_v28 = vsub.f32 %v2938_v33, %v1025_v59  ;;  %v1115_v8 = vsub.f32 %v2940_v34, %v1025_v59 }
 0x2d3   : > { %v3119_v21 = vpop.eup %2475  ;;  %2489 = vpow2.f32 %v1186_v56  ;;  %1297 = vadd.xlane.f32.xlu1 %v1296_v27 }
 0x2d4   : > { %v3121_v30 = vpop.eup %2477  ;;  %v1188_v31 = vmul.f32 1.442695, %v1114_v28  ;;  %v1190_v50 = vmul.f32 1.442695, %v1115_v8 }
 0x2d5   : > { %v1028_v22 = vpop.xlane.xlu0 %1027  ;;  %v1299_v16 = vadd.f32 %v3121_v30, %v3119_v21 }
 0x2d6   : > { %2491 = vpow2.f32 %v1188_v31  ;;  %v1116_v17 = vsub.f32 %v2944_v36, %v1028_v22  ;;  %v1117_v23 = vsub.f32 %v2946_v37, %v1028_v22 }
 0x2d7   : > { %v3127_v33 = vpop.eup %2479  ;;  %2493 = vpow2.f32 %v1190_v50  ;;  %1300 = vadd.xlane.f32.xlu1 %v1299_v16 }
 0x2d8   : > { %v3129_v34 = vpop.eup %2481  ;;  %v1192_v11 = vmul.f32 1.442695, %v1116_v17  ;;  %v1194_v19 = vmul.f32 1.442695, %v1117_v23 }
 0x2d9   : > { %v1031_v20 = vpop.xlane.xlu0 %1030  ;;  %v1302_v25 = vadd.f32 %v3129_v34, %v3127_v33 }
 0x2da   : > { %2495 = vpow2.f32 %v1192_v11  ;;  %v1118_v5 = vsub.f32 %v2950_v39, %v1031_v20  ;;  %v1119_v14 = vsub.f32 %v2952_v40, %v1031_v20 }
 0x2db   : > { %v3135_v36 = vpop.eup %2483  ;;  %2497 = vpow2.f32 %v1194_v19  ;;  %1303 = vadd.xlane.f32.xlu1 %v1302_v25 }
 0x2dc   : > { %v3137_v37 = vpop.eup %2485  ;;  %v1196_v0 = vmul.f32 1.442695, %v1118_v5  ;;  %v1198_v53 = vmul.f32 1.442695, %v1119_v14 }
 0x2dd   : > { %v1034_v56 = vpop.xlane.xlu0 %1033  ;;  %v1305_v59 = vadd.f32 %v3137_v37, %v3135_v36 }
 0x2de   : > { %2499 = vpow2.f32 %v1196_v0  ;;  %v1120_v27 = vsub.f32 %v2956_v42, %v1034_v56  ;;  %v1121_v28 = vsub.f32 %v2958_v43, %v1034_v56 }
 0x2df   : > { %v3143_v39 = vpop.eup %2487  ;;  %2501 = vpow2.f32 %v1198_v53  ;;  %1306 = vadd.xlane.f32.xlu1 %v1305_v59 }
 0x2e0   : > { %v3145_v40 = vpop.eup %2489  ;;  %v1200_v8 = vmul.f32 1.442695, %v1120_v27  ;;  %v1202_v31 = vmul.f32 1.442695, %v1121_v28 }
 0x2e1   : > { %v1037_v50 = vpop.xlane.xlu0 %1036  ;;  %v1308_v22 = vadd.f32 %v3145_v40, %v3143_v39 }
 0x2e2   : > { %2503 = vpow2.f32 %v1200_v8  ;;  %v1122_v16 = vsub.f32 %v2962_v45, %v1037_v50  ;;  %v1123_v17 = vsub.f32 %v2964_v46, %v1037_v50 }
 0x2e3   : > { %v3151_v42 = vpop.eup %2491  ;;  %2505 = vpow2.f32 %v1202_v31  ;;  %1309 = vadd.xlane.f32.xlu1 %v1308_v22 }
 0x2e4   : > { %v3153_v43 = vpop.eup %2493  ;;  %v1204_v23 = vmul.f32 1.442695, %v1122_v16  ;;  %v1206_v11 = vmul.f32 1.442695, %v1123_v17 }
 0x2e5   : > { %v1040_v19 = vpop.xlane.xlu0 %1039  ;;  %v1311_v20 = vadd.f32 %v3153_v43, %v3151_v42 }
 0x2e6   : > { %2507 = vpow2.f32 %v1204_v23  ;;  %v1124_v25 = vsub.f32 %v2968_v48, %v1040_v19  ;;  %v1125_v5 = vsub.f32 %v2970_v49, %v1040_v19 }
 0x2e7   : > { %v3159_v45 = vpop.eup %2495  ;;  %2509 = vpow2.f32 %v1206_v11  ;;  %1312 = vadd.xlane.f32.xlu1 %v1311_v20 }
 0x2e8   : > { %v3161_v46 = vpop.eup %2497  ;;  %v1208_v14 = vmul.f32 1.442695, %v1124_v25  ;;  %v1210_v0 = vmul.f32 1.442695, %v1125_v5 }
 0x2e9   : > { %v1043_v53 = vpop.xlane.xlu0 %1042  ;;  %v1314_v56 = vadd.f32 %v3161_v46, %v3159_v45 }
 0x2ea   : > { %2511 = vpow2.f32 %v1208_v14  ;;  %v1126_v59 = vsub.f32 %v2974_v51, %v1043_v53  ;;  %v1127_v27 = vsub.f32 %v2976_v52, %v1043_v53 }
 0x2eb   : > { %v3167_v48 = vpop.eup %2499  ;;  %2513 = vpow2.f32 %v1210_v0  ;;  %1315 = vadd.xlane.f32.xlu1 %v1314_v56 }
 0x2ec   : > { %v3169_v49 = vpop.eup %2501  ;;  %v1212_v28 = vmul.f32 1.442695, %v1126_v59  ;;  %v1214_v8 = vmul.f32 1.442695, %v1127_v27 }
 0x2ed   : > { %v1046_v31 = vpop.xlane.xlu0 %1045  ;;  %v1317_v50 = vadd.f32 %v3169_v49, %v3167_v48 }
 0x2ee   : > { %2515 = vpow2.f32 %v1212_v28  ;;  %v1128_v22 = vsub.f32 %v2980_v54, %v1046_v31  ;;  %v1129_v16 = vsub.f32 %v2982_v55, %v1046_v31 }
 0x2ef   : > { %v3175_v51 = vpop.eup %2503  ;;  %2517 = vpow2.f32 %v1214_v8  ;;  %1318 = vadd.xlane.f32.xlu1 %v1317_v50 }
 0x2f0   : > { %v3177_v52 = vpop.eup %2505  ;;  %v1216_v17 = vmul.f32 1.442695, %v1128_v22  ;;  %v1218_v23 = vmul.f32 1.442695, %v1129_v16 }
 0x2f1   : > { %v1049_v11 = vpop.xlane.xlu0 %1048  ;;  %v1320_v19 = vadd.f32 %v3177_v52, %v3175_v51 }
 0x2f2   : > { %2519 = vpow2.f32 %v1216_v17  ;;  %v1130_v20 = vsub.f32 %v2986_v57, %v1049_v11  ;;  %v1131_v25 = vsub.f32 %v2988_v58, %v1049_v11 }
 0x2f3   : > { %v3183_v54 = vpop.eup %2507  ;;  %2521 = vpow2.f32 %v1218_v23  ;;  %1321 = vadd.xlane.f32.xlu1 %v1320_v19 }
 0x2f4   : > { %v3185_v55 = vpop.eup %2509  ;;  %v1220_v5 = vmul.f32 1.442695, %v1130_v20  ;;  %v1222_v14 = vmul.f32 1.442695, %v1131_v25 }
 0x2f5   : > { %v1052_v0 = vpop.xlane.xlu0 %1051  ;;  %v1323_v53 = vadd.f32 %v3185_v55, %v3183_v54 }
 0x2f6   : > { %2523 = vpow2.f32 %v1220_v5  ;;  %v1132_v56 = vsub.f32 %v2992_v60, %v1052_v0  ;;  %v1133_v59 = vsub.f32 %v2994_v61, %v1052_v0 }
 0x2f7   : > { %v3191_v57 = vpop.eup %2511  ;;  %2525 = vpow2.f32 %v1222_v14  ;;  %1324 = vadd.xlane.f32.xlu1 %v1323_v53 }
 0x2f8   : > { %v3193_v58 = vpop.eup %2513  ;;  %v1224_v27 = vmul.f32 1.442695, %v1132_v56  ;;  %v1226_v28 = vmul.f32 1.442695, %v1133_v59 }
 0x2f9   : > { %v1055_v8 = vpop.xlane.xlu0 %1054  ;;  %v1326_v31 = vadd.f32 %v3193_v58, %v3191_v57 }
 0x2fa   : > { %2527 = vpow2.f32 %v1224_v27  ;;  %v1134_v50 = vsub.f32 %v2998_v63, %v1055_v8  ;;  %v1135_v22 = vsub.f32 %v3000_v1, %v1055_v8 }
 0x2fb   : > { %v3199_v60 = vpop.eup %2515  ;;  %2529 = vpow2.f32 %v1226_v28  ;;  %1327 = vadd.xlane.f32.xlu1 %v1326_v31 }
 0x2fc   : > { %v3201_v61 = vpop.eup %2517  ;;  %v1228_v16 = vmul.f32 1.442695, %v1134_v50  ;;  %v1230_v17 = vmul.f32 1.442695, %v1135_v22 }
 0x2fd   : > { %v1058_v23 = vpop.xlane.xlu0 %1057  ;;  %v1329_v11 = vadd.f32 %v3201_v61, %v3199_v60 }
 0x2fe   : > { %2531 = vpow2.f32 %v1228_v16  ;;  %v1136_v19 = vsub.f32 %v3004_v3, %v1058_v23  ;;  %v1137_v20 = vsub.f32 %v3006_v4, %v1058_v23 }
 0x2ff   : > { %v3207_v63 = vpop.eup %2519  ;;  %2533 = vpow2.f32 %v1230_v17  ;;  %1330 = vadd.xlane.f32.xlu1 %v1329_v11 }
 0x300   : > { %v3209_v1 = vpop.eup %2521  ;;  %v1232_v25 = vmul.f32 1.442695, %v1136_v19  ;;  %v1234_v5 = vmul.f32 1.442695, %v1137_v20 }
 0x301   : > { %v1061_v14 = vpop.xlane.xlu0 %1060  ;;  %v1332_v0 = vadd.f32 %v3209_v1, %v3207_v63 }
 0x302   : > { %2535 = vpow2.f32 %v1232_v25  ;;  %v1138_v53 = vsub.f32 %v3010_v6, %v1061_v14  ;;  %v1139_v56 = vsub.f32 %v3012_v7, %v1061_v14 }
 0x303   : > { %v3215_v3 = vpop.eup %2523  ;;  %2537 = vpow2.f32 %v1234_v5  ;;  %1333 = vadd.xlane.f32.xlu1 %v1332_v0  ;;  %v1083_v5 = vmax.f32 %v3058_v62, %v3060_v2 }
 0x304   : > { %v3217_v4 = vpop.eup %2525  ;;  %v1236_v59 = vmul.f32 1.442695, %v1138_v53  ;;  %v1238_v27 = vmul.f32 1.442695, %v1139_v56 }
 0x305   : > { %v1064_v28 = vpop.xlane.xlu1 %1063  ;;  %v1335_v8 = vadd.f32 %v3217_v4, %v3215_v3 }
 0x306   : > { %2539 = vpow2.f32 %v1236_v59  ;;  %v1140_v31 = vsub.f32 %v3016_v9, %v1064_v28  ;;  %v1141_v50 = vsub.f32 %v3018_v10, %v1064_v28 }
 0x307   : > { %v3223_v6 = vpop.eup %2527  ;;  %2541 = vpow2.f32 %v1238_v27  ;;  %1336 = vadd.xlane.f32.xlu1 %v1335_v8 }
 0x308   : > { %v3225_v7 = vpop.eup %2529  ;;  %v1240_v22 = vmul.f32 1.442695, %v1140_v31  ;;  %v1242_v16 = vmul.f32 1.442695, %v1141_v50 }
 0x309   : > { %v1067_v17 = vpop.xlane.xlu1 %1066  ;;  %v1338_v23 = vadd.f32 %v3225_v7, %v3223_v6 }
 0x30a   : > { %2543 = vpow2.f32 %v1240_v22  ;;  %v1142_v11 = vsub.f32 %v3022_v12, %v1067_v17  ;;  %v1143_v19 = vsub.f32 %v3024_v13, %v1067_v17 }
 0x30b   : > { %v3231_v9 = vpop.eup %2531  ;;  %2545 = vpow2.f32 %v1242_v16  ;;  %1339 = vadd.xlane.f32.xlu1 %v1338_v23 }
 0x30c   : > { %v3233_v10 = vpop.eup %2533  ;;  %v1244_v20 = vmul.f32 1.442695, %v1142_v11  ;;  %v1246_v25 = vmul.f32 1.442695, %v1143_v19 }
 0x30d   : > { %v1070_v14 = vpop.xlane.xlu1 %1069  ;;  %v1341_v0 = vadd.f32 %v3233_v10, %v3231_v9 }
 0x30e   : > { %2547 = vpow2.f32 %v1244_v20  ;;  %v1144_v12 = vsub.f32 %v3028_v15, %v1070_v14  ;;  %v1145_v13 = vsub.f32 %v3030_v18, %v1070_v14  ;;  %1084 = vmax.xlane.f32.xlu0 %v1083_v5 }
 0x30f   : > { %v3241_v53 = vpop.eup %2535  ;;  %2549 = vpow2.f32 %v1246_v25  ;;  %1342 = vadd.xlane.f32.xlu1 %v1341_v0 }
 0x310   : > { %v3243_v56 = vpop.eup %2537  ;;  %v1248_v59 = vmul.f32 1.442695, %v1144_v12  ;;  %v1250_v27 = vmul.f32 1.442695, %v1145_v13 }
 0x311   : > { %v1073_v28 = vpop.xlane.xlu1 %1072  ;;  %v1344_v8 = vadd.f32 %v3243_v56, %v3241_v53 }
 0x312   : > { %2551 = vpow2.f32 %v1248_v59  ;;  %v1146_v31 = vsub.f32 %v3034_v26, %v1073_v28  ;;  %v1147_v15 = vsub.f32 %v3036_v29, %v1073_v28 }
 0x313   : > { %v3249_v50 = vpop.eup %2539  ;;  %2553 = vpow2.f32 %v1250_v27  ;;  %1345 = vadd.xlane.f32.xlu1 %v1344_v8  ;;  %v3693_v8 = vld [vmem:[#allocation7_spill] sm:$0xff] }
 0x314   : > { %v3251_v18 = vpop.eup %2541  ;;  %v1252_v22 = vmul.f32 1.442695, %v1146_v31  ;;  %v1254_v16 = vmul.f32 1.442695, %v1147_v15  ;;  %v3694_v15 = vld [vmem:[#allocation8_spill] sm:$0xff] }
 0x315   : > { %v1076_v17 = vpop.xlane.xlu1 %1075  ;;  %v1347_v23 = vadd.f32 %v3251_v18, %v3249_v50 }
 0x316   : > { %2555 = vpow2.f32 %v1252_v22  ;;  %v1148_v11 = vsub.f32 %v3040_v35, %v1076_v17  ;;  %v1149_v19 = vsub.f32 %v3042_v38, %v1076_v17 }
 0x317   : > { %v3257_v26 = vpop.eup %2543  ;;  %2557 = vpow2.f32 %v1254_v16  ;;  %1348 = vadd.xlane.f32.xlu1 %v1347_v23 }
 0x318   : > { %3692 = vst [vmem:[#allocation20_spill] sm:$0xff] %v3257_v26  ;;  %v3259_v29 = vpop.eup %2545  ;;  %v1256_v20 = vmul.f32 1.442695, %v1148_v11  ;;  %v1258_v25 = vmul.f32 1.442695, %v1149_v19 }
 0x319   : > { %v1079_v5 = vpop.xlane.xlu1 %1078  ;;  %v1350_v14 = vadd.f32 %v3259_v29, %v3257_v26 }
 0x31a   : > { %2559 = vpow2.f32 %v1256_v20  ;;  %v1150_v0 = vsub.f32 %v3046_v44, %v1079_v5  ;;  %v1151_v12 = vsub.f32 %v3048_v47, %v1079_v5 }
 0x31b   : > { %v3265_v35 = vpop.eup %2547  ;;  %2561 = vpow2.f32 %v1258_v25  ;;  %1351 = vadd.xlane.f32.xlu1 %v1350_v14 }
 0x31c   : > { %v3267_v38 = vpop.eup %2549  ;;  %v1260_v13 = vmul.f32 1.442695, %v1150_v0  ;;  %v1262_v59 = vmul.f32 1.442695, %v1151_v12 }
 0x31d   : > { %v1082_v27 = vpop.xlane.xlu1 %1081  ;;  %v1353_v28 = vadd.f32 %v3267_v38, %v3265_v35 }
 0x31e   : > { %2563 = vpow2.f32 %v1260_v13  ;;  %v1152_v31 = vsub.f32 %v3693_v8, %v1082_v27  ;;  %v1153_v22 = vsub.f32 %v3694_v15, %v1082_v27 }
 0x31f   : > { %v3273_v44 = vpop.eup %2551  ;;  %2565 = vpow2.f32 %v1262_v59  ;;  %1354 = vadd.xlane.f32.xlu1 %v1353_v28 }
 0x320   : > { %3695 = vst [vmem:[#allocation7_spill] sm:$0xff] %v3273_v44  ;;  %v3275_v47 = vpop.eup %2553  ;;  %v1264_v16 = vmul.f32 1.442695, %v1152_v31  ;;  %v1266_v17 = vmul.f32 1.442695, %v1153_v22  ;;  %v3699_v31 = vld [vmem:[#allocation9_spill] sm:$0xff] }
 0x321   : > { %3696 = vst [vmem:[#allocation8_spill] sm:$0xff] %v3275_v47  ;;  %v2370_v23 = vpop.trf.xlu0  ;;  %v1356_v11 = vadd.f32 %v3275_v47, %v3273_v44  ;;  %v3700_v22 = vld [vmem:[#allocation10_spill] sm:$0xff] }
 0x322   : > { %2567 = vpow2.f32 %v1264_v16  ;;  %v2374_v19 = vunpack.i.h.bf16 %v2370_v23  ;;  %v2371_v25 = vunpack.i.l.bf16 %v2370_v23 }
 0x323   : > { %v3279_v20 = vpop.eup %2555  ;;  %2569 = vpow2.f32 %v1266_v17  ;;  %1357 = vadd.xlane.f32.xlu1 %v1356_v11 }
 0x324   : > { %3697 = vst [vmem:[#allocation21_spill] sm:$0xff] %v3279_v20  ;;  %v3281_v5 = vpop.eup %2557  ;;  %v2135_v14 = vpack.c.bf16 %v2374_v19, %v2374_v19  ;;  %v2151_v0 = vpack.c.bf16 %v2371_v25, %v2371_v25 }
 0x325   : > { %v2375_v12 = vpop.trf.xlu0  ;;  %v1088_v13 = vpop.xlane.xlu1 %1087  ;;  %v1359_v59 = vadd.f32 %v3281_v5, %v3279_v20 }
 0x326   : > { %577 = vst.msk [vmem:[#allocation3] sm:$0xf] %vm576_vm3, %v2135_v14  ;;  %v2379_v27 = vunpack.i.h.bf16 %v2375_v12  ;;  %v2376_v28 = vunpack.i.l.bf16 %v2375_v12  ;;  %593 = vst.msk [vmem:[#allocation3 + $0x40] sm:$0xf] %vm576_vm3, %v2151_v0  ;;  %v1156_v15 = vsub.f32 %v3699_v31, %v1088_v13  ;;  %v1157_v16 = vsub.f32 %v3700_v22, %v1088_v13 }
 0x327   : > { %v3286_v8 = vpop.eup %2559  ;;  %1360 = vadd.xlane.f32.xlu1 %v1359_v59 }
 0x328   : > { %3698 = vst [vmem:[#allocation22_spill] sm:$0xff] %v3286_v8  ;;  %v3291_v17 = vpop.eup %2561  ;;  %v2136_v23 = vpack.c.bf16 %v2379_v27, %v2379_v27  ;;  %v2152_v11 = vpack.c.bf16 %v2376_v28, %v2376_v28  ;;  %v1272_v19 = vmul.f32 1.442695, %v1156_v15  ;;  %v1274_v25 = vmul.f32 1.442695, %v1157_v16 }
 0x329   : > { %3701 = vst [vmem:[#allocation9_spill] sm:$0xff] %v3291_v17  ;;  %v2380_v44 = vpop.trf.xlu0  ;;  %v3293_v20 = vpop.xlane.xlu1 %1090  ;;  %v1362_v14 = vadd.f32 %v3291_v17, %v3286_v8 }
 0x32a   : > { %578 = vst.msk [vmem:[#allocation3 + $0x4] sm:$0xf] %vm576_vm3, %v2136_v23  ;;  %594 = vst.msk [vmem:[#allocation3 + $0x44] sm:$0xf] %vm576_vm3, %v2152_v11  ;;  %v2384_v0 = vunpack.i.h.bf16 %v2380_v44  ;;  %v2381_v12 = vunpack.i.l.bf16 %v2380_v44  ;;  %2571 = vpow2.f32 %v1272_v19  ;;  %v3705_v11 = vld [vmem:[#allocation13_spill] sm:$0xff] }
 0x32b   : > { %v3299_v13 = vpop.eup %2563  ;;  %1363 = vadd.xlane.f32.xlu0 %v1362_v14  ;;  %2573 = vpow2.f32 %v1274_v25  ;;  %v3706_v14 = vld [vmem:[#allocation14_spill] sm:$0xff] }
 0x32c   : > { %3702 = vst [vmem:[#allocation10_spill] sm:$0xff] %v3299_v13  ;;  %v3301_v59 = vpop.eup %2565  ;;  %v2137_v27 = vpack.c.bf16 %v2384_v0, %v2384_v0  ;;  %v2153_v28 = vpack.c.bf16 %v2381_v12, %v2381_v12 }
 0x32d   : > { %3703 = vst [vmem:[#allocation23_spill] sm:$0xff] %v3301_v59  ;;  %v2385_v31 = vpop.trf.xlu0  ;;  %v1094_v15 = vpop.xlane.xlu1 %1093  ;;  %v1365_v22 = vadd.f32 %v3301_v59, %v3299_v13 }
 0x32e   : > { %579 = vst.msk [vmem:[#allocation3 + $0x8] sm:$0xf] %vm576_vm3, %v2137_v27  ;;  %595 = vst.msk [vmem:[#allocation3 + $0x48] sm:$0xf] %vm576_vm3, %v2153_v28  ;;  %v2389_v16 = vunpack.i.h.bf16 %v2385_v31  ;;  %v2386_v44 = vunpack.i.l.bf16 %v2385_v31  ;;  %v1160_v19 = vsub.f32 %v3705_v11, %v1094_v15  ;;  %v1161_v8 = vsub.f32 %v3706_v14, %v1094_v15 }
 0x32f   : > { %v3307_v23 = vpop.eup %2567  ;;  %1366 = vadd.xlane.f32.xlu1 %v1365_v22 }
 0x330   : > { %3704 = vst [vmem:[#allocation24_spill] sm:$0xff] %v3307_v23  ;;  %v3311_v25 = vpop.eup %2569  ;;  %v2138_v0 = vpack.c.bf16 %v2389_v16, %v2389_v16  ;;  %v2154_v12 = vpack.c.bf16 %v2386_v44, %v2386_v44  ;;  %v1280_v17 = vmul.f32 1.442695, %v1160_v19  ;;  %v1282_v47 = vmul.f32 1.442695, %v1161_v8  ;;  %v3708_v19 = vld [vmem:[#allocation17_spill] sm:$0xff] }
 0x331   : > { %3707 = vst [vmem:[#allocation13_spill] sm:$0xff] %v3311_v25  ;;  %v2390_v13 = vpop.trf.xlu0  ;;  %v3313_v59 = vpop.xlane.xlu1 %1096  ;;  %v1368_v27 = vadd.f32 %v3311_v25, %v3307_v23 }
 0x332   : > { %580 = vst.msk [vmem:[#allocation3 + $0xc] sm:$0xf] %vm576_vm3, %v2138_v0  ;;  %596 = vst.msk [vmem:[#allocation3 + $0x4c] sm:$0xf] %vm576_vm3, %v2154_v12  ;;  %v2394_v28 = vunpack.i.h.bf16 %v2390_v13  ;;  %v2391_v31 = vunpack.i.l.bf16 %v2390_v13  ;;  %2575 = vpow2.f32 %v1280_v17  ;;  %v3709_v0 = vld [vmem:[#allocation18_spill] sm:$0xff] }
 0x333   : > { %1369 = vadd.xlane.f32.xlu0 %v1368_v27  ;;  %2577 = vpow2.f32 %v1282_v47 }
 0x334   : > { %v2139_v15 = vpack.c.bf16 %v2394_v28, %v2394_v28  ;;  %v2155_v22 = vpack.c.bf16 %v2391_v31, %v2391_v31 }
 0x335   : > { %v2395_v16 = vpop.trf.xlu0  ;;  %v1100_v44 = vpop.xlane.xlu1 %1099 }
 0x336   : > { %581 = vst.msk [vmem:[#allocation3 + $0x10] sm:$0xf] %vm576_vm3, %v2139_v15  ;;  %597 = vst.msk [vmem:[#allocation3 + $0x50] sm:$0xf] %vm576_vm3, %v2155_v22  ;;  %v2399_v8 = vunpack.i.h.bf16 %v2395_v16  ;;  %v2396_v11 = vunpack.i.l.bf16 %v2395_v16  ;;  %v1164_v14 = vsub.f32 %v3708_v19, %v1100_v44  ;;  %v1165_v23 = vsub.f32 %v3709_v0, %v1100_v44 }
 0x337   : > { %v3323_v12 = vpop.eup %2571 }
 0x338   : > { %3710 = vst [vmem:[#allocation14_spill] sm:$0xff] %v3323_v12  ;;  %v2140_v13 = vpack.c.bf16 %v2399_v8, %v2399_v8  ;;  %v2156_v17 = vpack.c.bf16 %v2396_v11, %v2396_v11  ;;  %v3325_v27 = vpop.eup %2573  ;;  %v1288_v47 = vmul.f32 1.442695, %v1164_v14  ;;  %v1290_v28 = vmul.f32 1.442695, %v1165_v23 }
 0x339   : > { %3711 = vst [vmem:[#allocation17_spill] sm:$0xff] %v3325_v27  ;;  %v2400_v31 = vpop.trf.xlu0  ;;  %v1374_v16 = vadd.f32 %v3325_v27, %v3323_v12 }
 0x33a   : > { %582 = vst.msk [vmem:[#allocation3 + $0x14] sm:$0xf] %vm576_vm3, %v2140_v13  ;;  %598 = vst.msk [vmem:[#allocation3 + $0x54] sm:$0xf] %vm576_vm3, %v2156_v17  ;;  %v2404_v15 = vunpack.i.h.bf16 %v2400_v31  ;;  %v2401_v22 = vunpack.i.l.bf16 %v2400_v31  ;;  %2579 = vpow2.f32 %v1288_v47 }
 0x33b   : > { %2581 = vpow2.f32 %v1290_v28  ;;  %1375 = vadd.xlane.f32.xlu0 %v1374_v16 }
 0x33c   : > { %v2141_v44 = vpack.c.bf16 %v2404_v15, %v2404_v15  ;;  %v2157_v19 = vpack.c.bf16 %v2401_v22, %v2401_v22 }
 0x33d   : > { %v2405_v8 = vpop.trf.xlu0 }
 0x33e   : > { %583 = vst.msk [vmem:[#allocation3 + $0x18] sm:$0xf] %vm576_vm3, %v2141_v44  ;;  %599 = vst.msk [vmem:[#allocation3 + $0x58] sm:$0xf] %vm576_vm3, %v2157_v19  ;;  %v2409_v23 = vunpack.i.h.bf16 %v2405_v8  ;;  %v2406_v11 = vunpack.i.l.bf16 %v2405_v8 }
 0x33f   : > { %v3333_v14 = vpop.eup %2575 }
 0x340   : > { %3712 = vst [vmem:[#allocation18_spill] sm:$0xff] %v3333_v14  ;;  %v2142_v0 = vpack.c.bf16 %v2409_v23, %v2409_v23  ;;  %v2158_v13 = vpack.c.bf16 %v2406_v11, %v2406_v11  ;;  %v3335_v17 = vpop.eup %2577 }
 0x341   : > { %3713 = vst [vmem:[#allocation25_spill] sm:$0xff] %v3335_v17  ;;  %v2410_v47 = vpop.trf.xlu0  ;;  %v1380_v15 = vadd.f32 %v3335_v17, %v3333_v14 }
 0x342   : > { %584 = vst.msk [vmem:[#allocation3 + $0x1c] sm:$0xf] %vm576_vm3, %v2142_v0  ;;  %600 = vst.msk [vmem:[#allocation3 + $0x5c] sm:$0xf] %vm576_vm3, %v2158_v13  ;;  %v2414_v28 = vunpack.i.h.bf16 %v2410_v47  ;;  %v2411_v31 = vunpack.i.l.bf16 %v2410_v47 }
 0x343   : > { %1381 = vadd.xlane.f32.xlu0 %v1380_v15 }
 0x344   : > { %v2143_v22 = vpack.c.bf16 %v2414_v28, %v2414_v28  ;;  %v2159_v16 = vpack.c.bf16 %v2411_v31, %v2411_v31 }
 0x345   : > { %v2415_v44 = vpop.trf.xlu0 }
 0x346   : > { %585 = vst.msk [vmem:[#allocation3 + $0x20] sm:$0xf] %vm576_vm3, %v2143_v22  ;;  %601 = vst.msk [vmem:[#allocation3 + $0x60] sm:$0xf] %vm576_vm3, %v2159_v16  ;;  %v2419_v19 = vunpack.i.h.bf16 %v2415_v44  ;;  %v2416_v8 = vunpack.i.l.bf16 %v2415_v44 }
 0x347   : > { %v3343_v23 = vpop.eup %2579 }
 0x348   : > { %3714 = vst [vmem:[#allocation26_spill] sm:$0xff] %v3343_v23  ;;  %v2144_v11 = vpack.c.bf16 %v2419_v19, %v2419_v19  ;;  %v2160_v0 = vpack.c.bf16 %v2416_v8, %v2416_v8  ;;  %v3345_v13 = vpop.eup %2581 }
 0x349   : > { %3715 = vst [vmem:[#allocation27_spill] sm:$0xff] %v3345_v13  ;;  %v2420_v47 = vpop.trf.xlu0  ;;  %v1386_v15 = vadd.f32 %v3345_v13, %v3343_v23  ;;  %v2463_v26 = vld [vmem:[#allocation3 + $0x18] sm:$0xff]  }
 0x34a   : > { %586 = vst.msk [vmem:[#allocation3 + $0x24] sm:$0xf] %vm576_vm3, %v2144_v11  ;;  %602 = vst.msk [vmem:[#allocation3 + $0x64] sm:$0xf] %vm576_vm3, %v2160_v0  ;;  %v2424_v28 = vunpack.i.h.bf16 %v2420_v47  ;;  %v2421_v31 = vunpack.i.l.bf16 %v2420_v47 }
 0x34b   : > { %1387 = vadd.xlane.f32.xlu0 %v1386_v15 }
 0x34c   : > { %v2145_v22 = vpack.c.bf16 %v2424_v28, %v2424_v28  ;;  %v2161_v16 = vpack.c.bf16 %v2421_v31, %v2421_v31 }
 0x34d   : > { %v2425_v44 = vpop.trf.xlu0 }
 0x34e   : > { %587 = vst.msk [vmem:[#allocation3 + $0x28] sm:$0xf] %vm576_vm3, %v2145_v22  ;;  %603 = vst.msk [vmem:[#allocation3 + $0x68] sm:$0xf] %vm576_vm3, %v2161_v16  ;;  %v2429_v19 = vunpack.i.h.bf16 %v2425_v44  ;;  %v2426_v8 = vunpack.i.l.bf16 %v2425_v44  ;;  %v3357_v16 = vpop.xlane.xlu1 %1102 }
 0x350   : > { %v2146_v14 = vpack.c.bf16 %v2429_v19, %v2429_v19  ;;  %v2162_v17 = vpack.c.bf16 %v2426_v8, %v2426_v8 }
 0x351   : > { %v2430_v11 = vpop.trf.xlu0  ;;  %v2460_v27 = vld [vmem:[#allocation3 + $0x60] sm:$0xff]  }
 0x352   : > { %588 = vst.msk [vmem:[#allocation3 + $0x2c] sm:$0xf] %vm576_vm3, %v2146_v14  ;;  %604 = vst.msk [vmem:[#allocation3 + $0x6c] sm:$0xf] %vm576_vm3, %v2162_v17  ;;  %v2434_v0 = vunpack.i.h.bf16 %v2430_v11  ;;  %v2431_v47 = vunpack.i.l.bf16 %v2430_v11 }
 0x354   : > { %v2147_v23 = vpack.c.bf16 %v2434_v0, %v2434_v0  ;;  %v2163_v28 = vpack.c.bf16 %v2431_v47, %v2431_v47 }
 0x355   : > { %v2435_v31 = vpop.trf.xlu0 }
 0x356   : > { %589 = vst.msk [vmem:[#allocation3 + $0x30] sm:$0xf] %vm576_vm3, %v2147_v23  ;;  %605 = vst.msk [vmem:[#allocation3 + $0x70] sm:$0xf] %vm576_vm3, %v2163_v28  ;;  %v2439_v15 = vunpack.i.h.bf16 %v2435_v31  ;;  %v2436_v22 = vunpack.i.l.bf16 %v2435_v31 }
 0x358   : > { %v2148_v44 = vpack.c.bf16 %v2439_v15, %v2439_v15  ;;  %v2164_v19 = vpack.c.bf16 %v2436_v22, %v2436_v22 }
 0x359   : > { %v2440_v8 = vpop.trf.xlu0 }
 0x35a   : > { %590 = vst.msk [vmem:[#allocation3 + $0x34] sm:$0xf] %vm576_vm3, %v2148_v44  ;;  %606 = vst.msk [vmem:[#allocation3 + $0x74] sm:$0xf] %vm576_vm3, %v2164_v19  ;;  %v2444_v14 = vunpack.i.h.bf16 %v2440_v8  ;;  %v2441_v17 = vunpack.i.l.bf16 %v2440_v8  ;;  %v1827_v44 = vld [vmem:[%s3645_s6] sm:$0xff] }
 0x35c   : > { %v2149_v11 = vpack.c.bf16 %v2444_v14, %v2444_v14  ;;  %v2165_v0 = vpack.c.bf16 %v2441_v17, %v2441_v17  ;;  %v1298_v47 = vpop.xlane.xlu1 %1297 }
 0x35d   : > { %v2445_v13 = vpop.trf.xlu0  ;;  %2583 = vrcp.f32 %v1298_v47 }
 0x35e   : > { %591 = vst.msk [vmem:[#allocation3 + $0x38] sm:$0xf] %vm576_vm3, %v2149_v11  ;;  %607 = vst.msk [vmem:[#allocation3 + $0x78] sm:$0xf] %vm576_vm3, %v2165_v0  ;;  %v2449_v23 = vunpack.i.h.bf16 %v2445_v13  ;;  %v2446_v28 = vunpack.i.l.bf16 %v2445_v13 }
 0x360   : > { %v2150_v31 = vpack.c.bf16 %v2449_v23, %v2449_v23  ;;  %v2166_v15 = vpack.c.bf16 %v2446_v28, %v2446_v28  ;;  %v1301_v22 = vpop.xlane.xlu1 %1300  ;;  %v2458_v23 = vld [vmem:[#allocation3 + $0x68] sm:$0xff]  }
 0x361   : > { %2585 = vrcp.f32 %v1301_v22  ;;  %1831 = vperm.xlu0 %2367, %v1827_v44   ;;  %v2456_v14 = vld [vmem:[#allocation3 + $0x70] sm:$0xff]  }
 0x362   : > { %592 = vst.msk [vmem:[#allocation3 + $0x3c] sm:$0xf] %vm576_vm3, %v2150_v31  ;;  %608 = vst.msk [vmem:[#allocation3 + $0x7c] sm:$0xf] %vm576_vm3, %v2166_v15  ;;  %v2457_v47 = vld [vmem:[#allocation3 + $0x30] sm:$0xff]   ;;  %v2459_v15 = vld [vmem:[#allocation3 + $0x28] sm:$0xff]  }
 0x364   : > { %v1304_v19 = vpop.xlane.xlu1 %1303 }
 0x368   : > { %v1307_v8 = vpop.xlane.xlu1 %1306 }
 0x369   : > { %v2454_v17 = vld [vmem:[#allocation3 + $0x78] sm:$0xff]   ;;  %2587 = vrcp.f32 %v1307_v8 }
 0x36a   : > { %v2455_v11 = vld [vmem:[#allocation3 + $0x38] sm:$0xff]   ;;  %2170 = vmatprep.subr.bf16.mxu1 %v2454_v17  ;;  %v2584_v13 = vpop.eup %2583  ;;  %v2461_v17 = vld [vmem:[#allocation3 + $0x20] sm:$0xff]   ;;  %2589 = vrcp.f32 %v1304_v19 }
 0x36b   : > { %2171 = vmatpush3.bf16.msra.mxu1 %v2455_v11  ;;  %v1425_v22 = vmul.f32 %v2584_v13, %v3113_v24  ;;  %v2462_v11 = vld [vmem:[#allocation3 + $0x58] sm:$0xff]   ;;  %v2464_v24 = vld [vmem:[#allocation3 + $0x50] sm:$0xff]  }
 0x36c   : > { %v1310_v0 = vpop.xlane.xlu1 %1309  ;;  %2172 = vmatprep.subr.bf16.mxu1 %v2456_v14 }
 0x36e   : > { %v2586_v28 = vpop.eup %2585 }
 0x36f   : > { %v1427_v31 = vmul.f32 %v2586_v28, %v3121_v30  ;;  %2173 = vmatpush3.bf16.msra.mxu1 %v2457_v47  ;;  %v2465_v47 = vld [vmem:[#allocation3 + $0x10] sm:$0xff]  }
 0x370   : > { %v1313_v12 = vpop.xlane.xlu1 %1312  ;;  %2174 = vmatprep.subr.bf16.mxu1 %v2458_v23  ;;  %v2466_v23 = vld [vmem:[#allocation3 + $0x48] sm:$0xff]  }
 0x371   : > { %v1489_v44 = vpack.c.bf16 %v1427_v31, %v1425_v22  ;;  %2591 = vrcp.f32 %v1313_v12  ;;  %v2467_v31 = vld [vmem:[#allocation3 + $0x8] sm:$0xff]   ;;  %v1424_v12 = vmul.f32 %v2584_v13, %v3111_v32 }
 0x372   : > { %2593 = vrcp.f32 %v1310_v0 }
 0x373   : > { %1680 = vmatprep.mubr.bf16.mxu1 %v1489_v44  ;;  %2175 = vmatpush3.bf16.msra.mxu1 %v2459_v15  ;;  %v2468_v15 = vld [vmem:[#allocation3 + $0x40] sm:$0xff]   ;;  %v1426_v44 = vmul.f32 %v2586_v28, %v3119_v21 }
 0x374   : > { %v1316_v25 = vpop.xlane.xlu1 %1315  ;;  %2176 = vmatprep.subr.bf16.mxu1 %v2460_v27 }
 0x376   : > { %v2588_v27 = vpop.eup %2587 }
 0x377   : > { %2177 = vmatpush3.bf16.msra.mxu1 %v2461_v17  ;;  %v2590_v19 = vpop.eup %2589  ;;  %v2469_v17 = vld [vmem:[#allocation3] sm:$0xff]   ;;  %v1430_v21 = vmul.f32 %v2588_v27, %v3135_v36 }
 0x378   : > { %v1319_v14 = vpop.xlane.xlu1 %1318  ;;  %2178 = vmatprep.subr.bf16.mxu1 %v2462_v11  ;;  %v1429_v11 = vmul.f32 %v2590_v19, %v3129_v34 }
 0x379   : > { %2595 = vrcp.f32 %v1319_v14 }
 0x37a   : > { %2597 = vrcp.f32 %v1316_v25 }
 0x37b   : > { %2179 = vmatpush3.bf16.msra.mxu1 %v2463_v26  ;;  %v1431_v26 = vmul.f32 %v2588_v27, %v3137_v37  ;;  %v1428_v37 = vmul.f32 %v2590_v19, %v3127_v33  ;;  %v3717_v33 = vld [vmem:[#allocation12_spill] sm:$0xff] }
 0x37c   : > { %v1322_v30 = vpop.xlane.xlu1 %1321  ;;  %2180 = vmatprep.subr.bf16.mxu1 %v2464_v24  ;;  %v1488_v24 = vpack.c.bf16 %v1426_v44, %v1424_v12  ;;  %v3716_v44 = vld [vmem:[#allocation11_spill] sm:$0xff] }
 0x37d   : > { %v1490_v13 = vpack.c.bf16 %v1430_v21, %v1428_v37 }
 0x37f   : > { %2181 = vmatpush3.bf16.msra.mxu1 %v2465_v47  ;;  %v1491_v47 = vpack.c.bf16 %v1431_v26, %v1429_v11 }
 0x380   : > { %v1325_v22 = vpop.xlane.xlu1 %1324  ;;  %2182 = vmatprep.subr.bf16.mxu1 %v2466_v23  ;;  %v2592_v23 = vpop.eup %2591 }
 0x381   : > { %2599 = vrcp.f32 %v1325_v22  ;;  %v1435_v28 = vmul.f32 %v2592_v23, %v3153_v43  ;;  %v1434_v36 = vmul.f32 %v2592_v23, %v3151_v42  ;;  %v3718_v42 = vld [vmem:[#allocation15_spill] sm:$0xff] }
 0x382   : > { %2601 = vrcp.f32 %v1322_v30  ;;  %v1159_v30 = vsub.f32 %v3717_v33, %v3293_v20 }
 0x383   : > { %2183 = vmatpush3.bf16.msra.mxu1 %v2467_v31 }
 0x384   : > { %v1328_v8 = vpop.xlane.xlu1 %1327  ;;  %2184 = vmatprep.subr.bf16.mxu1 %v2468_v15  ;;  %v2594_v15 = vpop.eup %2593  ;;  %v1278_v37 = vmul.f32 1.442695, %v1159_v30 }
 0x385   : > { %v1433_v25 = vmul.f32 %v2594_v15, %v3145_v40  ;;  %v1432_v27 = vmul.f32 %v2594_v15, %v3143_v39  ;;  %v3719_v39 = vld [vmem:[#allocation16_spill] sm:$0xff] }
 0x386   : > { %v2596_v14 = vpop.eup %2595 }
 0x387   : > { %2185 = vmatpush3.bf16.msra.mxu1 %v2469_v17  ;;  %v1493_v34 = vpack.c.bf16 %v1435_v28, %v1433_v25  ;;  %v1158_v17 = vsub.f32 %v3716_v44, %v3293_v20  ;;  %v2598_v12 = vpop.eup %2597  ;;  %v1439_v43 = vmul.f32 %v2596_v14, %v3169_v49  ;;  %v1492_v21 = vpack.c.bf16 %v1434_v36, %v1432_v27  ;;  %v3720_v44 = vld [vmem:[#allocation19_spill] sm:$0xff] }
 0x388   : > { %v1331_v0 = vpop.xlane.xlu1 %1330  ;;  %v1438_v15 = vmul.f32 %v2596_v14, %v3167_v48 }
 0x389   : > { %2603 = vrcp.f32 %v1331_v0  ;;  %v1276_v22 = vmul.f32 1.442695, %v1158_v17  ;;  %v1162_v0 = vsub.f32 %v3718_v42, %v3313_v59  ;;  %v1436_v17 = vmul.f32 %v2598_v12, %v3159_v45 }
 0x38a   : > { %1681 = vmatmul.mubr.bf16.vlgmr.msra.gmra.mxu1 %v1488_v24  ;;  %2605 = vrcp.f32 %v1328_v8  ;;  %v1163_v8 = vsub.f32 %v3719_v39, %v3313_v59  ;;  %v1167_v59 = vsub.f32 %v3720_v44, %v3357_v16 }
 0x38b   : > { %1688 = vmatprep.mubr.bf16.mxu1 %v1491_v47  ;;  %v1437_v47 = vmul.f32 %v2598_v12, %v3161_v46  ;;  %2607 = vpow2.f32 %v1276_v22  ;;  %v1284_v25 = vmul.f32 1.442695, %v1162_v0 }
 0x38c   : > { %v1334_v31 = vpop.xlane.xlu1 %1333  ;;  %v1294_v48 = vmul.f32 1.442695, %v1167_v59 }
 0x38d   : > { %v1495_v28 = vpack.c.bf16 %v1439_v43, %v1437_v47 }
 0x38e   : > { %v2600_v20 = vpop.eup %2599 }
 0x38f   : > { %v1442_v14 = vmul.f32 %v2600_v20, %v3183_v54 }
 0x390   : > { %v1337_v32 = vpop.xlane.xlu1 %1336 }
 0x392   : > { %1689 = vmatmul.mubr.bf16.gmra.mxu1 %v1490_v13  ;;  %v1443_v13 = vmul.f32 %v2600_v20, %v3185_v55 }
 0x393   : > { %1696 = vmatprep.mubr.bf16.mxu1 %v1493_v34  ;;  %v1286_v34 = vmul.f32 1.442695, %v1163_v8 }
 0x394   : > { %v1340_v26 = vpop.xlane.xlu1 %1339 }
 0x397   : > { %v1085_v40 = vpop.xlane.xlu0 %1084 }
 0x398   : > { %v1154_v19 = vsub.f32 %v3058_v62, %v1085_v40  ;;  %v1155_v11 = vsub.f32 %v3060_v2, %v1085_v40  ;;  %v1343_v24 = vpop.xlane.xlu1 %1342  ;;  %v2602_v62 = vpop.eup %2601  ;;  %v1166_v2 = vsub.f32 %v3095_v41, %v3357_v16  ;;  %v1494_v41 = vpack.c.bf16 %v1438_v15, %v1436_v17 }
 0x399   : > { %v1441_v36 = vmul.f32 %v2602_v62, %v3177_v52  ;;  %v2604_v30 = vpop.eup %2603  ;;  %v1440_v52 = vmul.f32 %v2602_v62, %v3175_v51 }
 0x39a   : > { %v1268_v49 = vmul.f32 1.442695, %v1154_v19  ;;  %v1270_v23 = vmul.f32 1.442695, %v1155_v11  ;;  %1697 = vmatmul.mubr.bf16.gmra.mxu1 %v1492_v21  ;;  %v1292_v43 = vmul.f32 1.442695, %v1166_v2  ;;  %v2606_v55 = vpop.eup %2605  ;;  %v1447_v45 = vmul.f32 %v2604_v30, %v3201_v61 }
 0x39b   : > { %1704 = vmatprep.mubr.bf16.mxu1 %v1495_v28  ;;  %v1497_v33 = vpack.c.bf16 %v1443_v13, %v1441_v36  ;;  %v3403_v16 = vpop.eup %2607  ;;  %v1496_v40 = vpack.c.bf16 %v1442_v14, %v1440_v52  ;;  %v1444_v42 = vmul.f32 %v2606_v55, %v3191_v57  ;;  %v3721_v52 = vld [vmem:[#allocation20_spill] sm:$0xff] }
 0x39c   : > { %2609 = vpow2.f32 %v1268_v49  ;;  %v1346_v46 = vpop.xlane.xlu1 %1345 }
 0x39d   : > { %2611 = vpow2.f32 %v1270_v23 }
 0x39e   : > { %2613 = vrcp.f32 %v1337_v32 }
 0x39f   : > { %2615 = vpow2.f32 %v1278_v37 }
 0x3a0   : > { %2617 = vrcp.f32 %v1334_v31  ;;  %v1349_v32 = vpop.xlane.xlu1 %1348  ;;  %v1445_v31 = vmul.f32 %v2606_v55, %v3193_v58 }
 0x3a1   : > { %2619 = vpow2.f32 %v1284_v25 }
 0x3a2   : > { %2621 = vpow2.f32 %v1286_v34  ;;  %1705 = vmatmul.mubr.bf16.gmra.mxu1 %v1494_v41  ;;  %v1499_v19 = vpack.c.bf16 %v1447_v45, %v1445_v31  ;;  %v3722_v31 = vld [vmem:[#allocation8_spill] sm:$0xff] }
 0x3a3   : > { %1712 = vmatprep.mubr.bf16.mxu1 %v1497_v33  ;;  %2623 = vpow2.f32 %v1292_v43 }
 0x3a4   : > { %2625 = vrcp.f32 %v1343_v24  ;;  %v1352_v22 = vpop.xlane.xlu1 %1351 }
 0x3a5   : > { %2627 = vpow2.f32 %v1294_v48 }
 0x3a6   : > { %2629 = vrcp.f32 %v1340_v26  ;;  %v1446_v26 = vmul.f32 %v2604_v30, %v3199_v60 }
 0x3a7   : > { %2631 = vrcp.f32 %v1349_v32 }
 0x3a8   : > { %v1355_v47 = vpop.xlane.xlu1 %1354  ;;  %2633 = vrcp.f32 %v1346_v46  ;;  %v1498_v23 = vpack.c.bf16 %v1446_v26, %v1444_v42  ;;  %v3725_v26 = vld [vmem:[#allocation7_spill] sm:$0xff]  ;;  %v3727_v42 = vld [vmem:[#allocation10_spill] sm:$0xff] }
 0x3a9   : > { %v3406_v12 = vpop.eup %2609  ;;  %2635 = vrcp.f32 %v1355_v47  ;;  %v3726_v47 = vld [vmem:[#allocation9_spill] sm:$0xff] }
 0x3aa   : > { %v3408_v27 = vpop.eup %2611  ;;  %1713 = vmatmul.mubr.bf16.gmra.mxu1 %v1496_v40  ;;  %2637 = vrcp.f32 %v1352_v22 }
 0x3ab   : > { %v2614_v11 = vpop.eup %2613  ;;  %v1371_v54 = vadd.f32 %v3408_v27, %v3406_v12  ;;  %1720 = vmatprep.mubr.bf16.mxu1 %v1499_v19  ;;  %v3723_v19 = vld [vmem:[#allocation21_spill] sm:$0xff] }
 0x3ac   : > { %v3412_v61 = vpop.eup %2615  ;;  %v1451_v58 = vmul.f32 %v2614_v11, %v3217_v4  ;;  %v1358_v57 = vpop.xlane.xlu1 %1357  ;;  %v1450_v8 = vmul.f32 %v2614_v11, %v3215_v3 }
 0x3ad   : > { %v2618_v51 = vpop.eup %2617  ;;  %1372 = vadd.xlane.f32.xlu1 %v1371_v54  ;;  %v1377_v21 = vadd.f32 %v3412_v61, %v3403_v16  ;;  %v3724_v54 = vld [vmem:[#allocation23_spill] sm:$0xff] }
 0x3ae   : > { %v3416_v24 = vpop.eup %2619  ;;  %v1449_v49 = vmul.f32 %v2618_v51, %v3209_v1  ;;  %v1448_v2 = vmul.f32 %v2618_v51, %v3207_v63 }
 0x3af   : > { %v3421_v0 = vpop.eup %2621 }
 0x3b0   : > { %v3424_v28 = vpop.eup %2623  ;;  %v1501_v60 = vpack.c.bf16 %v1451_v58, %v1449_v49  ;;  %v1383_v4 = vadd.f32 %v3421_v0, %v3416_v24  ;;  %v1500_v15 = vpack.c.bf16 %v1450_v8, %v1448_v2  ;;  %v1361_v34 = vpop.xlane.xlu1 %1360 }
 0x3b1   : > { %1378 = vadd.xlane.f32.xlu1 %v1377_v21  ;;  %v2626_v20 = vpop.eup %2625  ;;  %2639 = vrcp.f32 %v1361_v34 }
 0x3b2   : > { %1721 = vmatmul.mubr.bf16.gmra.mxu1 %v1498_v23  ;;  %v3428_v37 = vpop.eup %2627  ;;  %v1455_v1 = vmul.f32 %v2626_v20, %v3233_v10  ;;  %v1454_v3 = vmul.f32 %v2626_v20, %v3231_v9  ;;  %2641 = vrcp.f32 %v1358_v57  ;;  %v3728_v23 = vld [vmem:[#allocation22_spill] sm:$0xff] }
 0x3b3   : > { %1728 = vmatprep.mubr.bf16.mxu1 %v1501_v60  ;;  %v2630_v39 = vpop.eup %2629  ;;  %v1389_v62 = vadd.f32 %v3428_v37, %v3424_v28 }
 0x3b4   : > { %v1453_v46 = vmul.f32 %v2630_v39, %v3225_v7  ;;  %v2632_v13 = vpop.eup %2631  ;;  %v1452_v59 = vmul.f32 %v2630_v39, %v3223_v6  ;;  %v1364_v33 = vpop.xlane.xlu0 %1363 }
 0x3b5   : > { %1384 = vadd.xlane.f32.xlu1 %v1383_v4  ;;  %v2634_v44 = vpop.eup %2633  ;;  %v1459_v10 = vmul.f32 %v2632_v13, %v3251_v18  ;;  %v1458_v30 = vmul.f32 %v2632_v13, %v3249_v50  ;;  %v3729_v13 = vld [vmem:[#allocation13_spill] sm:$0xff] }
 0x3b6   : > { %v1503_v25 = vpack.c.bf16 %v1455_v1, %v1453_v46  ;;  %v1457_v63 = vmul.f32 %v2634_v44, %v3243_v56  ;;  %v1502_v17 = vpack.c.bf16 %v1454_v3, %v1452_v59  ;;  %v2636_v36 = vpop.eup %2635  ;;  %v1456_v18 = vmul.f32 %v2634_v44, %v3241_v53  ;;  %v3730_v3 = vld [vmem:[#allocation24_spill] sm:$0xff] }
 0x3b7   : > { %v2638_v41 = vpop.eup %2637  ;;  %v1463_v9 = vmul.f32 %v2636_v36, %v3267_v38  ;;  %v1462_v14 = vmul.f32 %v2636_v36, %v3265_v35 }
 0x3b8   : > { %v1505_v7 = vpack.c.bf16 %v1459_v10, %v1457_v63  ;;  %v1367_v43 = vpop.xlane.xlu1 %1366  ;;  %v1461_v6 = vmul.f32 %v2638_v41, %v3259_v29  ;;  %v1504_v48 = vpack.c.bf16 %v1458_v30, %v1456_v18  ;;  %v1460_v50 = vmul.f32 %v2638_v41, %v3721_v52 }
 0x3b9   : > { %1390 = vadd.xlane.f32.xlu1 %v1389_v62  ;;  %2643 = vrcp.f32 %v1367_v43  ;;  %v3731_v43 = vld [vmem:[#allocation17_spill] sm:$0xff] }
 0x3ba   : > { %1729 = vmatmul.mubr.bf16.gmra.mxu1 %v1500_v15  ;;  %2645 = vrcp.f32 %v1364_v33  ;;  %v1507_v56 = vpack.c.bf16 %v1463_v9, %v1461_v6  ;;  %v1506_v38 = vpack.c.bf16 %v1462_v14, %v1460_v50 }
 0x3bb   : > { %1736 = vmatprep.mubr.bf16.mxu1 %v1503_v25 }
 0x3bc   : > { %v1370_v4 = vpop.xlane.xlu0 %1369 }
 0x3bd   : > { %2647 = vrcp.f32 %v1370_v4 }
 0x3be   : > { %v2640_v32 = vpop.eup %2639 }
 0x3bf   : > { %v2642_v55 = vpop.eup %2641  ;;  %v1467_v45 = vmul.f32 %v2640_v32, %v3281_v5  ;;  %v1466_v11 = vmul.f32 %v2640_v32, %v3723_v19  ;;  %v3732_v32 = vld [vmem:[#allocation14_spill] sm:$0xff] }
 0x3c0   : > { %v1465_v22 = vmul.f32 %v2642_v55, %v3722_v31  ;;  %v1464_v58 = vmul.f32 %v2642_v55, %v3725_v26 }
 0x3c2   : > { %1737 = vmatmul.mubr.bf16.gmra.mxu1 %v1502_v17  ;;  %v1509_v40 = vpack.c.bf16 %v1467_v45, %v1465_v22  ;;  %v1508_v21 = vpack.c.bf16 %v1466_v11, %v1464_v58  ;;  %v3733_v45 = vld [vmem:[#allocation25_spill] sm:$0xff]  ;;  %v3735_v58 = vld [vmem:[#allocation27_spill] sm:$0xff] }
 0x3c3   : > { %1744 = vmatprep.mubr.bf16.mxu1 %v1505_v7 }
 0x3c4   : > { %v1376_v39 = vpop.xlane.xlu0 %1375 }
 0x3c6   : > { %v2644_v53 = vpop.eup %2643 }
 0x3c7   : > { %v2646_v29 = vpop.eup %2645  ;;  %v1471_v51 = vmul.f32 %v2644_v53, %v3724_v54  ;;  %v1470_v49 = vmul.f32 %v2644_v53, %v3727_v42  ;;  %v3734_v54 = vld [vmem:[#allocation18_spill] sm:$0xff] }
 0x3c8   : > { %v1469_v35 = vmul.f32 %v2646_v29, %v3726_v47  ;;  %v1468_v60 = vmul.f32 %v2646_v29, %v3728_v23 }
 0x3ca   : > { %1745 = vmatmul.mubr.bf16.gmra.mxu1 %v1504_v48  ;;  %v1511_v5 = vpack.c.bf16 %v1471_v51, %v1469_v35  ;;  %v1510_v20 = vpack.c.bf16 %v1470_v49, %v1468_v60  ;;  %v2648_v2 = vpop.eup %2647 }
 0x3cb   : > { %1752 = vmatprep.mubr.bf16.mxu1 %v1507_v56  ;;  %v1473_v34 = vmul.f32 %v2648_v2, %v3729_v13  ;;  %v1472_v10 = vmul.f32 %v2648_v2, %v3730_v3 }
 0x3cc   : > { %v1382_v1 = vpop.xlane.xlu0 %1381 }
 0x3d2   : > { %1753 = vmatmul.mubr.bf16.gmra.mxu1 %v1506_v38 }
 0x3d3   : > { %1760 = vmatprep.mubr.bf16.mxu1 %v1509_v40 }
 0x3d4   : > { %v1388_v25 = vpop.xlane.xlu0 %1387 }
 0x3da   : > { %1761 = vmatmul.mubr.bf16.gmra.mxu1 %v1508_v21 }
 0x3db   : > { %1768 = vmatprep.mubr.bf16.mxu1 %v1511_v5 }
 0x3e2   : > { %1769 = vmatmul.mubr.bf16.gmra.mxu1 %v1510_v20  ;;  %v3736_v20 = vld [vmem:[#allocation26_spill] sm:$0xff] }
 0x436   : > { %v1373_v57 = vpop.xlane.xlu1 %1372 }
 0x437   : > { %2649 = vrcp.f32 %v1373_v57 }
 0x438   : > { %2651 = vrcp.f32 %v1376_v39 }
 0x43a   : > { %v1379_v8 = vpop.xlane.xlu1 %1378 }
 0x43b   : > { %2653 = vrcp.f32 %v1379_v8 }
 0x43c   : > { %2655 = vrcp.f32 %v1382_v1 }
 0x43e   : > { %v1385_v62 = vpop.xlane.xlu1 %1384 }
 0x43f   : > { %2657 = vrcp.f32 %v1385_v62 }
 0x442   : > { %v1391_v46 = vpop.xlane.xlu1 %1390 }
 0x443   : > { %2659 = vrcp.f32 %v1391_v46 }
 0x444   : > { %v2650_v15 = vpop.eup %2649  ;;  %2661 = vrcp.f32 %v1388_v25 }
 0x445   : > { %v1475_v44 = vmul.f32 %v2650_v15, %v3408_v27  ;;  %v1474_v59 = vmul.f32 %v2650_v15, %v3406_v12  ;;  %v2652_v63 = vpop.eup %2651 }
 0x446   : > { %v1477_v41 = vmul.f32 %v2652_v63, %v3731_v43  ;;  %v1476_v55 = vmul.f32 %v2652_v63, %v3732_v32 }
 0x447   : > { %v1513_v17 = vpack.c.bf16 %v1475_v44, %v1473_v34  ;;  %v1512_v7 = vpack.c.bf16 %v1474_v59, %v1472_v10 }
 0x448   : > { %v2654_v36 = vpop.eup %2653 }
 0x449   : > { %1776 = vmatprep.mubr.bf16.mxu1 %v1513_v17  ;;  %v1479_v33 = vmul.f32 %v2654_v36, %v3412_v61  ;;  %v2656_v30 = vpop.eup %2655  ;;  %v1478_v27 = vmul.f32 %v2654_v36, %v3403_v16 }
 0x44a   : > { %1777 = vmatmul.mubr.bf16.gmra.mxu1 %v1512_v7  ;;  %v2186_v9 = vpop.f32.mrf.mxu1  ;;  %v1481_v52 = vmul.f32 %v2656_v30, %v3733_v45  ;;  %v1480_v51 = vmul.f32 %v2656_v30, %v3734_v54 }
 0x44b   : > { %v1515_v18 = vpack.c.bf16 %v1479_v33, %v1477_v41  ;;  %v1514_v50 = vpack.c.bf16 %v1478_v27, %v1476_v55 }
 0x44c   : > { %v2658_v6 = vpop.eup %2657  ;;  %v2187_v48 = vpop.f32.mrf.mxu1 }
 0x44d   : > { %1784 = vmatprep.mubr.bf16.mxu1 %v1515_v18  ;;  %v1483_v12 = vmul.f32 %v2658_v6, %v3421_v0  ;;  %v3462_v56 = vadd.f32 %v2187_v48, %v2186_v9  ;;  %v1482_v53 = vmul.f32 %v2658_v6, %v3416_v24 }
 0x44e   : > { %v2189_v14 = vpop.f32.mrf.mxu1 }
 0x44f   : > { %v1517_v31 = vpack.c.bf16 %v1483_v12, %v1481_v52  ;;  %v1516_v35 = vpack.c.bf16 %v1482_v53, %v1480_v51 }
 0x450   : > { %v2190_v61 = vpop.f32.mrf.mxu1  ;;  %v2660_v22 = vpop.eup %2659 }
 0x451   : > { %v3466_v38 = vadd.f32 %v2190_v61, %v2189_v14  ;;  %v2662_v40 = vpop.eup %2661  ;;  %v1487_v19 = vmul.f32 %v2660_v22, %v3428_v37  ;;  %v1486_v37 = vmul.f32 %v2660_v22, %v3424_v28 }
 0x452   : > { %1785 = vmatmul.mubr.bf16.gmra.mxu1 %v1514_v50  ;;  %v2192_v16 = vpop.f32.mrf.mxu1  ;;  %v1485_v47 = vmul.f32 %v2662_v40, %v3735_v58  ;;  %v1484_v4 = vmul.f32 %v2662_v40, %v3736_v20 }
 0x453   : > { %1792 = vmatprep.mubr.bf16.mxu1 %v1517_v31  ;;  %v1811_v0 = vpack.c.bf16 %v3466_v38, %v3462_v56 }
 0x454   : > { %v2193_v29 = vpop.f32.mrf.mxu1  ;;  %v1519_v5 = vpack.c.bf16 %v1487_v19, %v1485_v47  ;;  %v1518_v57 = vpack.c.bf16 %v1486_v37, %v1484_v4 }
 0x455   : > { %v3472_v11 = vadd.f32 %v2193_v29, %v2192_v16 }
 0x456   : > { %v2195_v26 = vpop.f32.mrf.mxu1 }
 0x458   : > { %v2196_v21 = vpop.f32.mrf.mxu1 }
 0x459   : > { %v3476_v42 = vadd.f32 %v2196_v21, %v2195_v26 }
 0x45a   : > { %1793 = vmatmul.mubr.bf16.gmra.mxu1 %v1516_v35  ;;  %v2198_v49 = vpop.f32.mrf.mxu1 }
 0x45b   : > { %1800 = vmatprep.mubr.bf16.mxu1 %v1519_v5  ;;  %v1812_v24 = vpack.c.bf16 %v3476_v42, %v3472_v11  ;;  %v1832_v11 = vpop.permute.xlu0 %1831 }
 0x45c   : > { %v2199_v23 = vpop.f32.mrf.mxu1 }
 0x45d   : > { %v3481_v60 = vadd.f32 %v2199_v23, %v2198_v49 }
 0x45e   : > { %v2201_v39 = vpop.f32.mrf.mxu1 }
 0x460   : > { %v2202_v8 = vpop.f32.mrf.mxu1 }
 0x461   : > { %v3484_v1 = vadd.f32 %v2202_v8, %v2201_v39 }
 0x462   : > { %1801 = vmatmul.mubr.bf16.gmra.mxu1 %v1518_v57  ;;  %v2204_v62 = vpop.f32.mrf.mxu1 }
 0x463   : > { %v1813_v2 = vpack.c.bf16 %v3484_v1, %v3481_v60  ;;  %v1848_v60 = vsel %vm759_vm2, %v1811_v0, 0  ;;  %v2663_v1 = vld [vmem:[%s2855_s23] sm:$0xff] }
 0x464   : > { %v2205_v46 = vpop.f32.mrf.mxu1  ;;  %v1943_v56 = vunpack.c.h.bf16 %v2663_v1 }
 0x465   : > { %v3488_v15 = vadd.f32 %v2205_v46, %v2204_v62  ;;  %v3527_v46 = vld [vmem:[%s3644_s5] sm:$0xff]  }
 0x466   : > { %v2207_v25 = vpop.f32.mrf.mxu1  ;;  %2298 = vmatprep.mubr.msk.bf16.mxu0 %vm759_vm2, %v3527_v46 }
 0x468   : > { %v2208_v28 = vpop.f32.mrf.mxu1 }
 0x469   : > { %v3490_v13 = vadd.f32 %v2208_v28, %v2207_v25  ;;  %v1828_v25 = vld [vmem:[%s3645_s6 + $0x8] sm:$0xff] }
 0x46a   : > { %v2210_v34 = vpop.f32.mrf.mxu1  ;;  %1836 = vperm.xlu1 %2450, %v1828_v25  }
 0x46b   : > { %v1814_v44 = vpack.c.bf16 %v3490_v13, %v3488_v15  ;;  %v1851_v15 = vsel %vm759_vm2, %v1812_v24, 0 }
 0x46c   : > { %v2211_v3 = vpop.f32.mrf.mxu1 }
 0x46d   : > { %v3494_v10 = vadd.f32 %v2211_v3, %v2210_v34 }
 0x46e   : > { %v2213_v59 = vpop.f32.mrf.mxu1 }
 0x470   : > { %v2214_v63 = vpop.f32.mrf.mxu1 }
 0x471   : > { %v3496_v17 = vadd.f32 %v2214_v63, %v2213_v59 }
 0x472   : > { %v2216_v7 = vpop.f32.mrf.mxu1 }
 0x473   : > { %v1815_v36 = vpack.c.bf16 %v3496_v17, %v3494_v10  ;;  %v1854_v10 = vsel %vm759_vm2, %v1813_v2, 0  ;;  %v1942_v2 = vunpack.c.l.bf16 %v2663_v1 }
 0x474   : > { %v2217_v43 = vpop.f32.mrf.mxu1 }
 0x475   : > { %v3500_v41 = vadd.f32 %v2217_v43, %v2216_v7 }
 0x476   : > { %v2219_v33 = vpop.f32.mrf.mxu1 }
 0x478   : > { %v2220_v30 = vpop.f32.mrf.mxu1 }
 0x479   : > { %v3502_v9 = vadd.f32 %v2220_v30, %v2219_v33 }
 0x47a   : > { %v2222_v18 = vpop.f32.mrf.mxu1 }
 0x47b   : > { %v1816_v6 = vpack.c.bf16 %v3502_v9, %v3500_v41  ;;  %v1857_v41 = vsel %vm759_vm2, %v1814_v44, 0 }
 0x47c   : > { %v2223_v27 = vpop.f32.mrf.mxu1 }
 0x47d   : > { %v3506_v48 = vadd.f32 %v2223_v27, %v2222_v18 }
 0x47e   : > { %v2225_v12 = vpop.f32.mrf.mxu1 }
 0x480   : > { %v2226_v32 = vpop.f32.mrf.mxu1 }
 0x481   : > { %v3508_v55 = vadd.f32 %v2226_v32, %v2225_v12 }
 0x482   : > { %v2228_v14 = vpop.f32.mrf.mxu1 }
 0x483   : > { %v1817_v45 = vpack.c.bf16 %v3508_v55, %v3506_v48  ;;  %v1860_v48 = vsel %vm759_vm2, %v1815_v36, 0 }
 0x484   : > { %v2229_v52 = vpop.f32.mrf.mxu1 }
 0x485   : > { %v2230_v50 = vadd.f32 %v2229_v52, %v2228_v14 }
 0x486   : > { %v2231_v61 = vpop.f32.mrf.mxu1 }
 0x488   : > { %v2232_v31 = vpop.f32.mrf.mxu1 }
 0x489   : > { %v2233_v22 = vadd.f32 %v2232_v31, %v2231_v61 }
 0x48a   : > { %v2234_v16 = vpop.f32.mrf.mxu1 }
 0x48b   : > { %v1818_v40 = vpack.c.bf16 %v2233_v22, %v2230_v50 }
 0x48c   : > { %v2235_v53 = vpop.f32.mrf.mxu1 }
 0x48d   : > { %v3512_v29 = vadd.f32 %v2235_v53, %v2234_v16 }
 0x48e   : > { %v2237_v19 = vpop.f32.mrf.mxu1 }
 0x490   : > { %v2238_v54 = vpop.f32.mrf.mxu1 }
 0x491   : > { %v3514_v51 = vadd.f32 %v2238_v54, %v2237_v19 }
 0x492   : > { %v2240_v26 = vpop.f32.mrf.mxu1 }
 0x493   : > { %v1819_v58 = vpack.c.bf16 %v3514_v51, %v3512_v29 }
 0x494   : > { %v2241_v47 = vpop.f32.mrf.mxu1 }
 0x495   : > { %v3518_v35 = vadd.f32 %v2241_v47, %v2240_v26 }
 0x496   : > { %v2243_v21 = vpop.f32.mrf.mxu1 }
 0x498   : > { %v2244_v5 = vpop.f32.mrf.mxu1 }
 0x499   : > { %v3520_v49 = vadd.f32 %v2244_v5, %v2243_v21  ;;  %v1869_v5 = vsel %vm759_vm2, %v1818_v40, 0  ;;  %v1863_v40 = vsel %vm759_vm2, %v1816_v6, 0  ;;  %v2664_v6 = vld [vmem:[%s2855_s23 + $0x8] sm:$0xff] }
 0x49a   : > { %v2246_v37 = vpop.f32.mrf.mxu1  ;;  %v1944_v55 = vunpack.c.l.bf16 %v2664_v6 }
 0x49b   : > { %v1820_v23 = vpack.c.bf16 %v3520_v49, %v3518_v35 }
 0x49c   : > { %v2247_v20 = vpop.f32.mrf.mxu1 }
 0x49d   : > { %v2248_v4 = vadd.f32 %v2247_v20, %v2246_v37 }
 0x49e   : > { %v2249_v39 = vpop.f32.mrf.mxu1 }
 0x4a0   : > { %v2250_v57 = vpop.f32.mrf.mxu1 }
 0x4a1   : > { %v2251_v8 = vadd.f32 %v2250_v57, %v2249_v39  ;;  %v1866_v39 = vsel %vm759_vm2, %v1817_v45, 0 }
 0x4a2   : > { %v2252_v28 = vpop.f32.mrf.mxu1 }
 0x4a3   : > { %v1821_v62 = vpack.c.bf16 %v2251_v8, %v2248_v4 }
 0x4a4   : > { %v2253_v34 = vpop.f32.mrf.mxu1 }
 0x4a6   : > { %v2255_v3 = vpop.f32.mrf.mxu1 }
 0x4a8   : > { %v2256_v59 = vpop.f32.mrf.mxu1 }
 0x4e5   : > { %v1837_v44 = vpop.permute.xlu1 %1836 }
 0x50a   : > { %v2258_v63 = vpop.f32.mrf.mxu1 }
 0x50c   : > { %v2259_v7 = vpop.f32.mrf.mxu1 }
 0x50d   : > { %v2260_v8 = vadd.f32 %v2259_v7, %v2258_v63 }
 0x50e   : > { %v2261_v43 = vpop.f32.mrf.mxu1 }
 0x510   : > { %v2262_v33 = vpop.f32.mrf.mxu1 }
 0x511   : > { %v2263_v57 = vadd.f32 %v2262_v33, %v2261_v43 }
 0x512   : > { %v2264_v30 = vpop.f32.mrf.mxu1 }
 0x513   : > { %v1823_v25 = vpack.c.bf16 %v2263_v57, %v2260_v8 }
 0x514   : > { %v2265_v18 = vpop.f32.mrf.mxu1 }
 0x515   : > { %v2266_v20 = vadd.f32 %v2265_v18, %v2264_v30  ;;  %v2257_v30 = vadd.f32 %v2256_v59, %v2255_v3  ;;  %v2254_v18 = vadd.f32 %v2253_v34, %v2252_v28 }
 0x516   : > { %v2267_v27 = vpop.f32.mrf.mxu1 }
 0x518   : > { %v2268_v12 = vpop.f32.mrf.mxu1 }
 0x519   : > { %v2269_v37 = vadd.f32 %v2268_v12, %v2267_v27  ;;  %v1822_v27 = vpack.c.bf16 %v2257_v30, %v2254_v18 }
 0x51a   : > { %v2270_v32 = vpop.f32.mrf.mxu1 }
 0x51b   : > { %v1824_v4 = vpack.c.bf16 %v2269_v37, %v2266_v20 }
 0x51c   : > { %v2271_v14 = vpop.f32.mrf.mxu1 }
 0x51d   : > { %v2272_v26 = vadd.f32 %v2271_v14, %v2270_v32 }
 0x51e   : > { %v2273_v52 = vpop.f32.mrf.mxu1 }
 0x520   : > { %v2274_v50 = vpop.f32.mrf.mxu1 }
 0x521   : > { %v2275_v53 = vadd.f32 %v2274_v50, %v2273_v52 }
 0x522   : > { %v2276_v61 = vpop.f32.mrf.mxu1 }
 0x523   : > { %v1825_v21 = vpack.c.bf16 %v2275_v53, %v2272_v26 }
 0x524   : > { %v2277_v31 = vpop.f32.mrf.mxu1 }
 0x525   : > { %v2278_v19 = vadd.f32 %v2277_v31, %v2276_v61 }
 0x526   : > { %v2279_v22 = vpop.f32.mrf.mxu1 }
 0x528   : > { %v2280_v16 = vpop.f32.mrf.mxu1 }
 0x529   : > { %v2281_v54 = vadd.f32 %v2280_v16, %v2279_v22 }
 0x52b   : > { %v1826_v47 = vpack.c.bf16 %v2281_v54, %v2278_v19 }
 0x52d   : > { %2300 = vmatprep.subr.msk.bf16.mxu0 %vm759_vm2, %v1826_v47 }
 0x52e   : > { %2283 = vmatpush3.bf16.xpose.msra.mxu0 %v1869_v5 }
 0x52f   : > { %2301 = vmatprep.subr.msk.bf16.mxu0 %vm759_vm2, %v1825_v21 }
 0x536   : > { %2285 = vmatpush3.bf16.xpose.msra.mxu0 %v1866_v39 }
 0x537   : > { %2302 = vmatprep.subr.msk.bf16.mxu0 %vm759_vm2, %v1824_v4 }
 0x53e   : > { %2287 = vmatpush3.bf16.xpose.msra.mxu0 %v1863_v40 }
 0x53f   : > { %2303 = vmatprep.subr.msk.bf16.mxu0 %vm759_vm2, %v1823_v25 }
 0x546   : > { %2289 = vmatpush3.bf16.xpose.msra.mxu0 %v1860_v48 }
 0x547   : > { %2304 = vmatprep.subr.msk.bf16.mxu0 %vm759_vm2, %v1822_v27 }
 0x54e   : > { %2291 = vmatpush3.bf16.xpose.msra.mxu0 %v1857_v41 }
 0x54f   : > { %2305 = vmatprep.subr.msk.bf16.mxu0 %vm759_vm2, %v1821_v62 }
 0x556   : > { %2293 = vmatpush3.bf16.xpose.msra.mxu0 %v1854_v10 }
 0x557   : > { %2306 = vmatprep.subr.msk.bf16.mxu0 %vm759_vm2, %v1820_v23 }
 0x55e   : > { %2295 = vmatpush3.bf16.xpose.msra.mxu0 %v1851_v15 }
 0x55f   : > { %2307 = vmatprep.subr.msk.bf16.mxu0 %vm759_vm2, %v1819_v58  ;;  %v1945_v58 = vunpack.c.h.bf16 %v2664_v6 }
 0x566   : > { %2297 = vmatpush3.bf16.xpose.msra.mxu0 %v1848_v60 }
 0x56d   : > { %2299 = vmatmul.mubr.msk.bf16.vlgmr.msra.gmra.mxu0 %vm759_vm2, %v3527_v46 }
 0x62d   : > { %v1929_v42 = vpop.f32.mrf.mxu0 }
 0x62e   : > { %v1930_v24 = vadd.f32 %v1929_v42, %v1832_v11 }
 0x62f   : > { %v1931_v13 = vpop.f32.mrf.mxu0 }
 0x630   : > { %v1938_v17 = vmax.f32 %v1930_v24, 0.0  ;;  %v1932_v36 = vadd.f32 %v1931_v13, %v1832_v11 }
 0x631   : > { %v1933_v38 = vpop.f32.mrf.mxu0 }
 0x632   : > { %v1946_v0 = vadd.f32 %v1942_v2, %v1938_v17  ;;  %v1939_v9 = vmax.f32 %v1932_v36, 0.0  ;;  %v1934_v45 = vadd.f32 %v1933_v38, %v1837_v44 }
 0x633   : > { %v1935_v29 = vpop.f32.mrf.mxu0 }
 0x634   : > { %1950 = vst [vmem:[%s285_s10] sm:$0xff] %v1946_v0  ;;  %v1947_v51 = vadd.f32 %v1943_v56, %v1939_v9  ;;  %v1936_v35 = vadd.f32 %v1935_v29, %v1837_v44  ;;  %v1940_v49 = vmax.f32 %v1934_v45, 0.0 }
 0x636   : > { %1951 = vst [vmem:[%s285_s10 + $0x8] sm:$0xff] %v1947_v51  ;;  %v1941_v23 = vmax.f32 %v1936_v35, 0.0  ;;  %v1948_v62 = vadd.f32 %v1944_v55, %v1940_v49 }
 0x638   : > { %v1949_v46 = vadd.f32 %v1945_v58, %v1941_v23  ;;  %1952 = vst [vmem:[%s285_s10 + $0x10] sm:$0xff] %v1948_v62 }
 0x63a   : > { %1953 = vst [vmem:[%s285_s10 + $0x18] sm:$0xff] %v1949_v46 }
 0x63b   : > { %2678 = shalt.err (!%p2675_p5)
}
 0x63c   : > { %s2679_s22 = scalar_lea.hbm %s3590_s17, 512  ;;  %s2683_s10 = scalar_lea.hbm %s3646_s7, 1024 }
 0x63d   : > { %p2680_p6 = scmp.ne.s32.totalorder %s3590_s17, %s2679_s22  ;;  %p2684_p10 = scmp.lt.s32.totalorder %s3590_s17, %s3646_s7 }
 0x63e   : > { %p2685_p11 = scmp.lt.s32.totalorder %s2683_s10, %s2679_s22 }
 0x63f   : > { %p2681_p7 = pnand %p2680_p6, %p2827_p4 }
 0x640   : > { %p2686_p12 = por %p2685_p11, %p2684_p10 }
 0x641   : > { %p2682_p9 = pneg %p2681_p7 }
 0x643   : > { %p2687_p13 = pnand %p2686_p12, %p2682_p9 }
 0x645   : > { %2690 = shalt.err (!%p2687_p13)
}
 0x646   : > { %s2745_s16 = smov 256   ;;  %s2746_s27 = smov 16  }
 0x647   : > { %2308 = dma.vmem_to_hbm [thread:$0]  (%p2827_p4), %s3585_s12, 512, %s3590_s17, %s3594_s18, %s2745_s16, %s2745_s16, %s2746_s27  }
 0x648 PF: > { %p2314_p0 = scmp.ge.s32.totalorder %s2741_s29, 2  ;;  %s1985_s19 = sand.u32 1, %s2721_s24  }
 0x649   : > { %s1986_s20 = scalar_lea.sflag [#allocation5], %s1985_s19 }
 0x64a   : > { %p2311_p1 = pnand %p2314_p0, %p2834_p8 }
 0x64c   : > { %p2312_p2 = pneg %p2311_p1 }
 0x64e   : > { %2716 = dma.done.wait (%p2312_p2), %s1986_s20, 512  }
 0x64f   : > { %2718 = vsyncadd (%p2312_p2), %s1986_s20, 4294966784  ;;  %s20_s29 = sadd.s32 1, %s2741_s29   ;;  %s3737_s24 = smov %s2725_s25 }
 0x650   : > { %p17_p3 = scmp.ge.s32.totalorder %s20_s29, 4   ;;  %s3738_s25 = smov %s2729_s26 }
 0x651   : > { %s3739_s26 = smov %s2840_s14  ;;  %s3740_s27 = smov %s2737_s28 }
 0x652   : > { %s3741_s28 = smov %s3743_s9  ;;  %19 = sbr.rel (!%p17_p3) target bundleno = 4 (0x4), region = 87 }
 0x657   :  { %1991 = vsyncpa [#allocation5], 1 }
 0x658   :  { %1993 = vsyncpa [#allocation5 + $0x1], 1 }

</bundles_post_ra>
